<compile_context>
chip_gen: v6e
topology: v6e:2x2x1
jax: 0.10.0
libtpu: 0.0.40
codegen_flags: <defaults>
</compile_context>

<pallas_src>
import math
import jax
import jax.numpy as jnp
import numpy as np
from jax import lax
from jax.experimental import pallas as pl
from jax.experimental.pallas import tpu as pltpu

# ---------------- configuration (small, consistent with the module) ----------
B = 2            # batch
N = 8            # sequence length (tokens)
C = 32           # embedding dim
NUM_HEADS = 4
HEAD_DIM = C // NUM_HEADS
MLP_RATIO = 4.0
HIDDEN = int(C * MLP_RATIO)
SCALE = HEAD_DIM ** (-0.5)
LN_EPS = 1e-5


def _layernorm(v, g, b):
    mu = jnp.mean(v, axis=-1, keepdims=True)
    var = jnp.mean((v - mu) ** 2, axis=-1, keepdims=True)
    return (v - mu) * lax.rsqrt(var + LN_EPS) * g + b


def _gelu_exact(v):
    # PyTorch nn.GELU default = exact erf-based GELU
    return 0.5 * v * (1.0 + lax.erf(v * jnp.float32(0.7071067811865476)))


def block_kernel(x_ref,
                 ln1g_ref, ln1b_ref,
                 wqkv_ref,
                 wproj_ref, bproj_ref,
                 ln2g_ref, ln2b_ref,
                 w1_ref, b1_ref,
                 w2_ref, b2_ref,
                 o_ref):
    rows = x_ref.shape[0]            # static: tokens handled in this grid step
    nb = rows // N                   # batch elements in this step (1 or B)

    x = x_ref[...].astype(jnp.float32)                         # (rows, C) f32

    # ---- Attention branch -------------------------------------------------
    xn = _layernorm(x, ln1g_ref[...], ln1b_ref[...])            # f32
    qkv = jnp.dot(xn.astype(jnp.bfloat16), wqkv_ref[...],       # bf16 MXU, f32 acc
                  preferred_element_type=jnp.float32)           # (rows, 3C)

    # fold the softmax scale into q once; cast matmul operands to bf16 once
    q = (qkv[:, 0 * C:1 * C] * jnp.float32(SCALE)).astype(jnp.bfloat16)
    k = qkv[:, 1 * C:2 * C].astype(jnp.bfloat16)
    v = qkv[:, 2 * C:3 * C].astype(jnp.bfloat16)

    y_parts = []
    for b in range(nb):                                         # static unroll
        r0 = b * N
        acc = jnp.zeros((N, C), jnp.float32)                    # per-batch proj acc
        for h in range(NUM_HEADS):                              # static unroll
            lo = h * HEAD_DIM
            qh = q[r0:r0 + N, lo:lo + HEAD_DIM]                 # (N, D) bf16
            kh = k[r0:r0 + N, lo:lo + HEAD_DIM]
            vh = v[r0:r0 + N, lo:lo + HEAD_DIM]
            # scores = (q*scale) @ k^T  (contract last dims, no transpose)
            s = lax.dot_general(qh, kh, (((1,), (1,)), ((), ())),
                                preferred_element_type=jnp.float32)   # (N, N) f32
            s = s - jnp.max(s, axis=-1, keepdims=True)
            p = jnp.exp(s)
            p = p * pl.reciprocal(jnp.sum(p, axis=-1, keepdims=True), approx=True)
            hout = jnp.dot(p.astype(jnp.bfloat16), vh,
                           preferred_element_type=jnp.float32)        # (N, D)
            # fold the output projection into the head loop: no concat over heads
            acc = acc + jnp.dot(hout.astype(jnp.bfloat16), wproj_ref[h],
                                preferred_element_type=jnp.float32)   # (N, C)
        y_parts.append(acc)
    y = y_parts[0] if nb == 1 else jnp.concatenate(y_parts, axis=0)   # (rows, C)
    x = x + y + bproj_ref[...]                                  # residual 1 (+ proj bias)

    # ---- MLP branch --------------------------------------------------------
    xn2 = _layernorm(x, ln2g_ref[...], ln2b_ref[...])
    h1 = jnp.dot(xn2.astype(jnp.bfloat16), w1_ref[...],
                 preferred_element_type=jnp.float32) + b1_ref[...]
    h1 = _gelu_exact(h1)
    mlp = jnp.dot(h1.astype(jnp.bfloat16), w2_ref[...],
                  preferred_element_type=jnp.float32) + b2_ref[...]
    x = x + mlp                                                 # residual 2

    o_ref[...] = x.astype(o_ref.dtype)


def _grid_steps(batch):
    """v7x has 2 TensorCores/chip: keep a parallel grid axis of 2 so both cores
    get work.  v5e/v6e have 1 TC: a single grid step minimizes fixed per-step
    overhead (and the constant-index weights are never revisited)."""
    try:
        kind = jax.devices()[0].device_kind.lower()
    except Exception:
        kind = ""
    if ("v7" in kind or "tpu7" in kind) and batch % 2 == 0:
        return 2
    return 1


def block_forward(x, params):
    """x: (B, N, C) float32; params: dict of f32 weights (see init_params)."""
    b, n, c = x.shape
    rows = b * n
    g = _grid_steps(b)
    rows_per_step = rows // g
    x2 = x.reshape(rows, c)                                     # flatten batch+tokens

    bf16 = jnp.bfloat16
    # MXU operands in bf16 (weights cast once in the wrapper); biases / LN stay f32.
    w_qkv = params["w_qkv"].astype(bf16)                        # (C, 3C)
    w_proj = params["w_proj"].reshape(NUM_HEADS, HEAD_DIM, c).astype(bf16)
    w1 = params["w1"].astype(bf16)                              # (C, HIDDEN)
    w2 = params["w2"].astype(bf16)                              # (HIDDEN, C)

    def full(arr):
        zeros = (0,) * arr.ndim
        return pl.BlockSpec(arr.shape, lambda i: zeros)

    in_specs = [
        pl.BlockSpec((rows_per_step, c), lambda i: (i, 0)),     # x (flattened)
        full(params["ln1_g"]), full(params["ln1_b"]),           # ln1 gamma / beta
        full(w_qkv),                                            # W_qkv (in, 3*out)
        full(w_proj), full(params["b_proj"]),                   # W_proj (H,D,C), b_proj
        full(params["ln2_g"]), full(params["ln2_b"]),           # ln2 gamma / beta
        full(w1), full(params["b1"]),                           # fc1
        full(w2), full(params["b2"]),                           # fc2
    ]
    out = pl.pallas_call(
        block_kernel,
        out_shape=jax.ShapeDtypeStruct((rows, c), x.dtype),
        grid_spec=pltpu.PrefetchScalarGridSpec(
            num_scalar_prefetch=0,
            grid=(g,),
            in_specs=in_specs,
            out_specs=pl.BlockSpec((rows_per_step, c), lambda i: (i, 0)),
        ),
        compiler_params=pltpu.CompilerParams(
            dimension_semantics=("parallel",)),
    )(x2,
      params["ln1_g"], params["ln1_b"],
      w_qkv,
      w_proj, params["b_proj"],
      params["ln2_g"], params["ln2_b"],
      w1, params["b1"],
      w2, params["b2"])
    return out.reshape(b, n, c)


def init_params(key):
    ks = jax.random.split(key, 8)
    s = 0.02
    return {
        "ln1_g": jnp.ones((1, C), jnp.float32),
        "ln1_b": jnp.zeros((1, C), jnp.float32),
        # qkv_bias=False in the reference module; weights stored as (in, out)
        "w_qkv": s * jax.random.normal(ks[0], (C, 3 * C), jnp.float32),
        "w_proj": s * jax.random.normal(ks[1], (C, C), jnp.float32),
        "b_proj": s * jax.random.normal(ks[2], (1, C), jnp.float32),
        "ln2_g": jnp.ones((1, C), jnp.float32),
        "ln2_b": jnp.zeros((1, C), jnp.float32),
        "w1": s * jax.random.normal(ks[3], (C, HIDDEN), jnp.float32),
        "b1": s * jax.random.normal(ks[4], (1, HIDDEN), jnp.float32),
        "w2": s * jax.random.normal(ks[5], (HIDDEN, C), jnp.float32),
        "b2": s * jax.random.normal(ks[6], (1, C), jnp.float32),
    }


def block_reference(x, p):
    """Pure-JAX f32 reference mirroring the PyTorch Block.forward (eval mode)."""
    bb, nn_, cc = x.shape

    def ln(v, g, b):
        mu = jnp.mean(v, -1, keepdims=True)
        var = jnp.mean((v - mu) ** 2, -1, keepdims=True)
        return (v - mu) / jnp.sqrt(var + LN_EPS) * g + b

    xn = ln(x, p["ln1_g"][0], p["ln1_b"][0])
    qkv = xn @ p["w_qkv"]                                       # (B,N,3C)
    qkv = qkv.reshape(bb, nn_, 3, NUM_HEADS, HEAD_DIM).transpose(2, 0, 3, 1, 4)
    q, k, v = qkv[0], qkv[1], qkv[2]                            # (B,H,N,D)
    attn = jnp.einsum("bhqd,bhkd->bhqk", q, k) * SCALE
    attn = jax.nn.softmax(attn, axis=-1)
    y = jnp.einsum("bhqk,bhkd->bhqd", attn, v)
    y = y.transpose(0, 2, 1, 3).reshape(bb, nn_, cc)
    y = y @ p["w_proj"] + p["b_proj"][0]
    x = x + y
    xn2 = ln(x, p["ln2_g"][0], p["ln2_b"][0])
    h = xn2 @ p["w1"] + p["b1"][0]
    h = 0.5 * h * (1.0 + lax.erf(h / jnp.sqrt(2.0)))
    mlp = h @ p["w2"] + p["b2"][0]
    return x + mlp


if __name__ == "__main__":
    key = jax.random.PRNGKey(0)
    kx, kp = jax.random.split(key)
    x = jax.random.normal(kx, (B, N, C), jnp.float32)
    params = init_params(kp)

    out = block_forward(x, params)
    out = jax.block_until_ready(out)

    ref = block_reference(x, params)
    np.testing.assert_allclose(np.asarray(out), np.asarray(ref),
                               rtol=1e-3, atol=1e-3)
    print("KERNEL_OK")
</pallas_src>

<mosaic_0001>
module attributes {stable_mosaic.version = 11 : i64} {
  func.func @block_kernel(%arg0: i32, %arg1: memref<16x32xf32, #tpu.memory_space<vmem>>, %arg2: memref<1x32xf32, #tpu.memory_space<vmem>>, %arg3: memref<1x32xf32, #tpu.memory_space<vmem>>, %arg4: memref<32x96xbf16, #tpu.memory_space<vmem>>, %arg5: memref<4x8x32xbf16, #tpu.memory_space<vmem>>, %arg6: memref<1x32xf32, #tpu.memory_space<vmem>>, %arg7: memref<1x32xf32, #tpu.memory_space<vmem>>, %arg8: memref<1x32xf32, #tpu.memory_space<vmem>>, %arg9: memref<32x128xbf16, #tpu.memory_space<vmem>>, %arg10: memref<1x128xf32, #tpu.memory_space<vmem>>, %arg11: memref<128x32xbf16, #tpu.memory_space<vmem>>, %arg12: memref<1x32xf32, #tpu.memory_space<vmem>>, %arg13: memref<16x32xf32, #tpu.memory_space<vmem>>) attributes {dimension_semantics = [#tpu.dimension_semantics<parallel>], iteration_bounds = array<i64: 1>, scalar_prefetch = 0 : i64, scratch_operands = 0 : i64, tpu.core_type = #tpu.core_type<tc>, window_params = [{transform_indices = @transform_0, window_bounds = array<i64: 16, 32>}, {pipeline_mode = #tpu.pipeline_mode<synchronous>, transform_indices = @transform_1, window_bounds = array<i64: 1, 32>}, {pipeline_mode = #tpu.pipeline_mode<synchronous>, transform_indices = @transform_2, window_bounds = array<i64: 1, 32>}, {pipeline_mode = #tpu.pipeline_mode<synchronous>, transform_indices = @transform_3, window_bounds = array<i64: 32, 96>}, {pipeline_mode = #tpu.pipeline_mode<synchronous>, transform_indices = @transform_4, window_bounds = array<i64: 4, 8, 32>}, {pipeline_mode = #tpu.pipeline_mode<synchronous>, transform_indices = @transform_5, window_bounds = array<i64: 1, 32>}, {pipeline_mode = #tpu.pipeline_mode<synchronous>, transform_indices = @transform_6, window_bounds = array<i64: 1, 32>}, {pipeline_mode = #tpu.pipeline_mode<synchronous>, transform_indices = @transform_7, window_bounds = array<i64: 1, 32>}, {pipeline_mode = #tpu.pipeline_mode<synchronous>, transform_indices = @transform_8, window_bounds = array<i64: 32, 128>}, {pipeline_mode = #tpu.pipeline_mode<synchronous>, transform_indices = @transform_9, window_bounds = array<i64: 1, 128>}, {pipeline_mode = #tpu.pipeline_mode<synchronous>, transform_indices = @transform_10, window_bounds = array<i64: 128, 32>}, {pipeline_mode = #tpu.pipeline_mode<synchronous>, transform_indices = @transform_11, window_bounds = array<i64: 1, 32>}, {transform_indices = @transform_12, window_bounds = array<i64: 16, 32>}]} {
    %c0 = arith.constant 0 : index
    %c0_0 = arith.constant 0 : index
    %0 = vector.load %arg1[%c0, %c0_0] : memref<16x32xf32, #tpu.memory_space<vmem>>, vector<16x32xf32>
    %c0_1 = arith.constant 0 : index
    %c0_2 = arith.constant 0 : index
    %1 = vector.load %arg2[%c0_1, %c0_2] : memref<1x32xf32, #tpu.memory_space<vmem>>, vector<1x32xf32>
    %c0_3 = arith.constant 0 : index
    %c0_4 = arith.constant 0 : index
    %2 = vector.load %arg3[%c0_3, %c0_4] : memref<1x32xf32, #tpu.memory_space<vmem>>, vector<1x32xf32>
    %cst = arith.constant dense<0.000000e+00> : vector<16xf32>
    %3 = vector.multi_reduction <add>, %0, %cst [1] : vector<16x32xf32> to vector<16xf32>
    %4 = vector.shape_cast %3 : vector<16xf32> to vector<16x1xf32>
    %cst_5 = arith.constant 3.200000e+01 : f32
    %5 = vector.broadcast %cst_5 : f32 to vector<16x1xf32>
    %6 = arith.divf %4, %5 : vector<16x1xf32>
    %7 = vector.broadcast %6 : vector<16x1xf32> to vector<16x32xf32>
    %8 = arith.subf %0, %7 : vector<16x32xf32>
    %9 = arith.mulf %8, %8 : vector<16x32xf32>
    %cst_6 = arith.constant dense<0.000000e+00> : vector<16xf32>
    %10 = vector.multi_reduction <add>, %9, %cst_6 [1] : vector<16x32xf32> to vector<16xf32>
    %11 = vector.shape_cast %10 : vector<16xf32> to vector<16x1xf32>
    %cst_7 = arith.constant 3.200000e+01 : f32
    %12 = vector.broadcast %cst_7 : f32 to vector<16x1xf32>
    %13 = arith.divf %11, %12 : vector<16x1xf32>
    %14 = vector.broadcast %6 : vector<16x1xf32> to vector<16x32xf32>
    %15 = arith.subf %0, %14 : vector<16x32xf32>
    %cst_8 = arith.constant 9.99999974E-6 : f32
    %16 = vector.broadcast %cst_8 : f32 to vector<16x1xf32>
    %17 = arith.addf %13, %16 : vector<16x1xf32>
    %18 = math.rsqrt %17 : vector<16x1xf32>
    %19 = vector.broadcast %18 : vector<16x1xf32> to vector<16x32xf32>
    %20 = arith.mulf %15, %19 : vector<16x32xf32>
    %21 = vector.broadcast %1 : vector<1x32xf32> to vector<16x32xf32>
    %22 = arith.mulf %20, %21 : vector<16x32xf32>
    %23 = vector.broadcast %2 : vector<1x32xf32> to vector<16x32xf32>
    %24 = arith.addf %22, %23 : vector<16x32xf32>
    %25 = arith.truncf %24 : vector<16x32xf32> to vector<16x32xbf16>
    %c0_9 = arith.constant 0 : index
    %c0_10 = arith.constant 0 : index
    %26 = vector.load %arg4[%c0_9, %c0_10] : memref<32x96xbf16, #tpu.memory_space<vmem>>, vector<32x96xbf16>
    %cst_11 = arith.constant dense<0.000000e+00> : vector<16x96xf32>
    %27 = tpu.matmul %25, %26, %cst_11 {dimension_numbers = #tpu.dot_dimension_numbers<[1], [0], [0], [1], [0, 0, 1, 1], [], []>} : vector<16x32xbf16>, vector<32x96xbf16>, vector<16x96xf32> -> vector<16x96xf32>
    %28 = vector.extract_strided_slice %27 {offsets = [0, 0], sizes = [16, 32], strides = [1, 1]} : vector<16x96xf32> to vector<16x32xf32>
    %cst_12 = arith.constant 0.353553385 : f32
    %29 = vector.broadcast %cst_12 : f32 to vector<16x32xf32>
    %30 = arith.mulf %28, %29 : vector<16x32xf32>
    %31 = arith.truncf %30 : vector<16x32xf32> to vector<16x32xbf16>
    %32 = vector.extract_strided_slice %27 {offsets = [0, 32], sizes = [16, 32], strides = [1, 1]} : vector<16x96xf32> to vector<16x32xf32>
    %33 = arith.truncf %32 : vector<16x32xf32> to vector<16x32xbf16>
    %34 = vector.extract_strided_slice %27 {offsets = [0, 64], sizes = [16, 32], strides = [1, 1]} : vector<16x96xf32> to vector<16x32xf32>
    %35 = arith.truncf %34 : vector<16x32xf32> to vector<16x32xbf16>
    %cst_13 = arith.constant 0.000000e+00 : f32
    %36 = vector.broadcast %cst_13 : f32 to vector<8x32xf32>
    %37 = vector.extract_strided_slice %31 {offsets = [0, 0], sizes = [8, 8], strides = [1, 1]} : vector<16x32xbf16> to vector<8x8xbf16>
    %38 = vector.extract_strided_slice %33 {offsets = [0, 0], sizes = [8, 8], strides = [1, 1]} : vector<16x32xbf16> to vector<8x8xbf16>
    %39 = vector.extract_strided_slice %35 {offsets = [0, 0], sizes = [8, 8], strides = [1, 1]} : vector<16x32xbf16> to vector<8x8xbf16>
    %cst_14 = arith.constant dense<0.000000e+00> : vector<8x8xf32>
    %40 = tpu.matmul %37, %38, %cst_14 {dimension_numbers = #tpu.dot_dimension_numbers<[1], [1], [0], [0], [0, 0, 1, 0], [], []>} : vector<8x8xbf16>, vector<8x8xbf16>, vector<8x8xf32> -> vector<8x8xf32>
    %cst_15 = arith.constant dense<0xFF800000> : vector<8xf32>
    %41 = vector.multi_reduction <maximumf>, %40, %cst_15 [1] : vector<8x8xf32> to vector<8xf32>
    %42 = vector.shape_cast %41 : vector<8xf32> to vector<8x1xf32>
    %43 = vector.broadcast %42 : vector<8x1xf32> to vector<8x8xf32>
    %44 = arith.subf %40, %43 : vector<8x8xf32>
    %45 = math.exp %44 : vector<8x8xf32>
    %cst_16 = arith.constant dense<0.000000e+00> : vector<8xf32>
    %46 = vector.multi_reduction <add>, %45, %cst_16 [1] : vector<8x8xf32> to vector<8xf32>
    %47 = vector.shape_cast %46 : vector<8xf32> to vector<8x1xf32>
    %48 = tpu.reciprocal %47 {approx = true} : vector<8x1xf32> -> vector<8x1xf32>
    %49 = vector.broadcast %48 : vector<8x1xf32> to vector<8x8xf32>
    %50 = arith.mulf %45, %49 : vector<8x8xf32>
    %51 = arith.truncf %50 : vector<8x8xf32> to vector<8x8xbf16>
    %cst_17 = arith.constant dense<0.000000e+00> : vector<8x8xf32>
    %52 = tpu.matmul %51, %39, %cst_17 {dimension_numbers = #tpu.dot_dimension_numbers<[1], [0], [0], [1], [0, 0, 1, 1], [], []>} : vector<8x8xbf16>, vector<8x8xbf16>, vector<8x8xf32> -> vector<8x8xf32>
    %53 = arith.truncf %52 : vector<8x8xf32> to vector<8x8xbf16>
    %c0_18 = arith.constant 0 : index
    %c0_19 = arith.constant 0 : index
    %c0_20 = arith.constant 0 : index
    %54 = vector.load %arg5[%c0_18, %c0_19, %c0_20] : memref<4x8x32xbf16, #tpu.memory_space<vmem>>, vector<1x8x32xbf16>
    %55 = vector.shape_cast %54 : vector<1x8x32xbf16> to vector<8x32xbf16>
    %cst_21 = arith.constant dense<0.000000e+00> : vector<8x32xf32>
    %56 = tpu.matmul %53, %55, %cst_21 {dimension_numbers = #tpu.dot_dimension_numbers<[1], [0], [0], [1], [0, 0, 1, 1], [], []>} : vector<8x8xbf16>, vector<8x32xbf16>, vector<8x32xf32> -> vector<8x32xf32>
    %57 = arith.addf %36, %56 : vector<8x32xf32>
    %58 = vector.extract_strided_slice %31 {offsets = [0, 8], sizes = [8, 8], strides = [1, 1]} : vector<16x32xbf16> to vector<8x8xbf16>
    %59 = vector.extract_strided_slice %33 {offsets = [0, 8], sizes = [8, 8], strides = [1, 1]} : vector<16x32xbf16> to vector<8x8xbf16>
    %60 = vector.extract_strided_slice %35 {offsets = [0, 8], sizes = [8, 8], strides = [1, 1]} : vector<16x32xbf16> to vector<8x8xbf16>
    %cst_22 = arith.constant dense<0.000000e+00> : vector<8x8xf32>
    %61 = tpu.matmul %58, %59, %cst_22 {dimension_numbers = #tpu.dot_dimension_numbers<[1], [1], [0], [0], [0, 0, 1, 0], [], []>} : vector<8x8xbf16>, vector<8x8xbf16>, vector<8x8xf32> -> vector<8x8xf32>
    %cst_23 = arith.constant dense<0xFF800000> : vector<8xf32>
    %62 = vector.multi_reduction <maximumf>, %61, %cst_23 [1] : vector<8x8xf32> to vector<8xf32>
    %63 = vector.shape_cast %62 : vector<8xf32> to vector<8x1xf32>
    %64 = vector.broadcast %63 : vector<8x1xf32> to vector<8x8xf32>
    %65 = arith.subf %61, %64 : vector<8x8xf32>
    %66 = math.exp %65 : vector<8x8xf32>
    %cst_24 = arith.constant dense<0.000000e+00> : vector<8xf32>
    %67 = vector.multi_reduction <add>, %66, %cst_24 [1] : vector<8x8xf32> to vector<8xf32>
    %68 = vector.shape_cast %67 : vector<8xf32> to vector<8x1xf32>
    %69 = tpu.reciprocal %68 {approx = true} : vector<8x1xf32> -> vector<8x1xf32>
    %70 = vector.broadcast %69 : vector<8x1xf32> to vector<8x8xf32>
    %71 = arith.mulf %66, %70 : vector<8x8xf32>
    %72 = arith.truncf %71 : vector<8x8xf32> to vector<8x8xbf16>
    %cst_25 = arith.constant dense<0.000000e+00> : vector<8x8xf32>
    %73 = tpu.matmul %72, %60, %cst_25 {dimension_numbers = #tpu.dot_dimension_numbers<[1], [0], [0], [1], [0, 0, 1, 1], [], []>} : vector<8x8xbf16>, vector<8x8xbf16>, vector<8x8xf32> -> vector<8x8xf32>
    %74 = arith.truncf %73 : vector<8x8xf32> to vector<8x8xbf16>
    %c1 = arith.constant 1 : index
    %c0_26 = arith.constant 0 : index
    %c0_27 = arith.constant 0 : index
    %75 = vector.load %arg5[%c1, %c0_26, %c0_27] : memref<4x8x32xbf16, #tpu.memory_space<vmem>>, vector<1x8x32xbf16>
    %76 = vector.shape_cast %75 : vector<1x8x32xbf16> to vector<8x32xbf16>
    %cst_28 = arith.constant dense<0.000000e+00> : vector<8x32xf32>
    %77 = tpu.matmul %74, %76, %cst_28 {dimension_numbers = #tpu.dot_dimension_numbers<[1], [0], [0], [1], [0, 0, 1, 1], [], []>} : vector<8x8xbf16>, vector<8x32xbf16>, vector<8x32xf32> -> vector<8x32xf32>
    %78 = arith.addf %57, %77 : vector<8x32xf32>
    %79 = vector.extract_strided_slice %31 {offsets = [0, 16], sizes = [8, 8], strides = [1, 1]} : vector<16x32xbf16> to vector<8x8xbf16>
    %80 = vector.extract_strided_slice %33 {offsets = [0, 16], sizes = [8, 8], strides = [1, 1]} : vector<16x32xbf16> to vector<8x8xbf16>
    %81 = vector.extract_strided_slice %35 {offsets = [0, 16], sizes = [8, 8], strides = [1, 1]} : vector<16x32xbf16> to vector<8x8xbf16>
    %cst_29 = arith.constant dense<0.000000e+00> : vector<8x8xf32>
    %82 = tpu.matmul %79, %80, %cst_29 {dimension_numbers = #tpu.dot_dimension_numbers<[1], [1], [0], [0], [0, 0, 1, 0], [], []>} : vector<8x8xbf16>, vector<8x8xbf16>, vector<8x8xf32> -> vector<8x8xf32>
    %cst_30 = arith.constant dense<0xFF800000> : vector<8xf32>
    %83 = vector.multi_reduction <maximumf>, %82, %cst_30 [1] : vector<8x8xf32> to vector<8xf32>
    %84 = vector.shape_cast %83 : vector<8xf32> to vector<8x1xf32>
    %85 = vector.broadcast %84 : vector<8x1xf32> to vector<8x8xf32>
    %86 = arith.subf %82, %85 : vector<8x8xf32>
    %87 = math.exp %86 : vector<8x8xf32>
    %cst_31 = arith.constant dense<0.000000e+00> : vector<8xf32>
    %88 = vector.multi_reduction <add>, %87, %cst_31 [1] : vector<8x8xf32> to vector<8xf32>
    %89 = vector.shape_cast %88 : vector<8xf32> to vector<8x1xf32>
    %90 = tpu.reciprocal %89 {approx = true} : vector<8x1xf32> -> vector<8x1xf32>
    %91 = vector.broadcast %90 : vector<8x1xf32> to vector<8x8xf32>
    %92 = arith.mulf %87, %91 : vector<8x8xf32>
    %93 = arith.truncf %92 : vector<8x8xf32> to vector<8x8xbf16>
    %cst_32 = arith.constant dense<0.000000e+00> : vector<8x8xf32>
    %94 = tpu.matmul %93, %81, %cst_32 {dimension_numbers = #tpu.dot_dimension_numbers<[1], [0], [0], [1], [0, 0, 1, 1], [], []>} : vector<8x8xbf16>, vector<8x8xbf16>, vector<8x8xf32> -> vector<8x8xf32>
    %95 = arith.truncf %94 : vector<8x8xf32> to vector<8x8xbf16>
    %c2 = arith.constant 2 : index
    %c0_33 = arith.constant 0 : index
    %c0_34 = arith.constant 0 : index
    %96 = vector.load %arg5[%c2, %c0_33, %c0_34] : memref<4x8x32xbf16, #tpu.memory_space<vmem>>, vector<1x8x32xbf16>
    %97 = vector.shape_cast %96 : vector<1x8x32xbf16> to vector<8x32xbf16>
    %cst_35 = arith.constant dense<0.000000e+00> : vector<8x32xf32>
    %98 = tpu.matmul %95, %97, %cst_35 {dimension_numbers = #tpu.dot_dimension_numbers<[1], [0], [0], [1], [0, 0, 1, 1], [], []>} : vector<8x8xbf16>, vector<8x32xbf16>, vector<8x32xf32> -> vector<8x32xf32>
    %99 = arith.addf %78, %98 : vector<8x32xf32>
    %100 = vector.extract_strided_slice %31 {offsets = [0, 24], sizes = [8, 8], strides = [1, 1]} : vector<16x32xbf16> to vector<8x8xbf16>
    %101 = vector.extract_strided_slice %33 {offsets = [0, 24], sizes = [8, 8], strides = [1, 1]} : vector<16x32xbf16> to vector<8x8xbf16>
    %102 = vector.extract_strided_slice %35 {offsets = [0, 24], sizes = [8, 8], strides = [1, 1]} : vector<16x32xbf16> to vector<8x8xbf16>
    %cst_36 = arith.constant dense<0.000000e+00> : vector<8x8xf32>
    %103 = tpu.matmul %100, %101, %cst_36 {dimension_numbers = #tpu.dot_dimension_numbers<[1], [1], [0], [0], [0, 0, 1, 0], [], []>} : vector<8x8xbf16>, vector<8x8xbf16>, vector<8x8xf32> -> vector<8x8xf32>
    %cst_37 = arith.constant dense<0xFF800000> : vector<8xf32>
    %104 = vector.multi_reduction <maximumf>, %103, %cst_37 [1] : vector<8x8xf32> to vector<8xf32>
    %105 = vector.shape_cast %104 : vector<8xf32> to vector<8x1xf32>
    %106 = vector.broadcast %105 : vector<8x1xf32> to vector<8x8xf32>
    %107 = arith.subf %103, %106 : vector<8x8xf32>
    %108 = math.exp %107 : vector<8x8xf32>
    %cst_38 = arith.constant dense<0.000000e+00> : vector<8xf32>
    %109 = vector.multi_reduction <add>, %108, %cst_38 [1] : vector<8x8xf32> to vector<8xf32>
    %110 = vector.shape_cast %109 : vector<8xf32> to vector<8x1xf32>
    %111 = tpu.reciprocal %110 {approx = true} : vector<8x1xf32> -> vector<8x1xf32>
    %112 = vector.broadcast %111 : vector<8x1xf32> to vector<8x8xf32>
    %113 = arith.mulf %108, %112 : vector<8x8xf32>
    %114 = arith.truncf %113 : vector<8x8xf32> to vector<8x8xbf16>
    %cst_39 = arith.constant dense<0.000000e+00> : vector<8x8xf32>
    %115 = tpu.matmul %114, %102, %cst_39 {dimension_numbers = #tpu.dot_dimension_numbers<[1], [0], [0], [1], [0, 0, 1, 1], [], []>} : vector<8x8xbf16>, vector<8x8xbf16>, vector<8x8xf32> -> vector<8x8xf32>
    %116 = arith.truncf %115 : vector<8x8xf32> to vector<8x8xbf16>
    %c3 = arith.constant 3 : index
    %c0_40 = arith.constant 0 : index
    %c0_41 = arith.constant 0 : index
    %117 = vector.load %arg5[%c3, %c0_40, %c0_41] : memref<4x8x32xbf16, #tpu.memory_space<vmem>>, vector<1x8x32xbf16>
    %118 = vector.shape_cast %117 : vector<1x8x32xbf16> to vector<8x32xbf16>
    %cst_42 = arith.constant dense<0.000000e+00> : vector<8x32xf32>
    %119 = tpu.matmul %116, %118, %cst_42 {dimension_numbers = #tpu.dot_dimension_numbers<[1], [0], [0], [1], [0, 0, 1, 1], [], []>} : vector<8x8xbf16>, vector<8x32xbf16>, vector<8x32xf32> -> vector<8x32xf32>
    %120 = arith.addf %99, %119 : vector<8x32xf32>
    %cst_43 = arith.constant 0.000000e+00 : f32
    %121 = vector.broadcast %cst_43 : f32 to vector<8x32xf32>
    %122 = vector.extract_strided_slice %31 {offsets = [8, 0], sizes = [8, 8], strides = [1, 1]} : vector<16x32xbf16> to vector<8x8xbf16>
    %123 = vector.extract_strided_slice %33 {offsets = [8, 0], sizes = [8, 8], strides = [1, 1]} : vector<16x32xbf16> to vector<8x8xbf16>
    %124 = vector.extract_strided_slice %35 {offsets = [8, 0], sizes = [8, 8], strides = [1, 1]} : vector<16x32xbf16> to vector<8x8xbf16>
    %cst_44 = arith.constant dense<0.000000e+00> : vector<8x8xf32>
    %125 = tpu.matmul %122, %123, %cst_44 {dimension_numbers = #tpu.dot_dimension_numbers<[1], [1], [0], [0], [0, 0, 1, 0], [], []>} : vector<8x8xbf16>, vector<8x8xbf16>, vector<8x8xf32> -> vector<8x8xf32>
    %cst_45 = arith.constant dense<0xFF800000> : vector<8xf32>
    %126 = vector.multi_reduction <maximumf>, %125, %cst_45 [1] : vector<8x8xf32> to vector<8xf32>
    %127 = vector.shape_cast %126 : vector<8xf32> to vector<8x1xf32>
    %128 = vector.broadcast %127 : vector<8x1xf32> to vector<8x8xf32>
    %129 = arith.subf %125, %128 : vector<8x8xf32>
    %130 = math.exp %129 : vector<8x8xf32>
    %cst_46 = arith.constant dense<0.000000e+00> : vector<8xf32>
    %131 = vector.multi_reduction <add>, %130, %cst_46 [1] : vector<8x8xf32> to vector<8xf32>
    %132 = vector.shape_cast %131 : vector<8xf32> to vector<8x1xf32>
    %133 = tpu.reciprocal %132 {approx = true} : vector<8x1xf32> -> vector<8x1xf32>
    %134 = vector.broadcast %133 : vector<8x1xf32> to vector<8x8xf32>
    %135 = arith.mulf %130, %134 : vector<8x8xf32>
    %136 = arith.truncf %135 : vector<8x8xf32> to vector<8x8xbf16>
    %cst_47 = arith.constant dense<0.000000e+00> : vector<8x8xf32>
    %137 = tpu.matmul %136, %124, %cst_47 {dimension_numbers = #tpu.dot_dimension_numbers<[1], [0], [0], [1], [0, 0, 1, 1], [], []>} : vector<8x8xbf16>, vector<8x8xbf16>, vector<8x8xf32> -> vector<8x8xf32>
    %138 = arith.truncf %137 : vector<8x8xf32> to vector<8x8xbf16>
    %c0_48 = arith.constant 0 : index
    %c0_49 = arith.constant 0 : index
    %c0_50 = arith.constant 0 : index
    %139 = vector.load %arg5[%c0_48, %c0_49, %c0_50] : memref<4x8x32xbf16, #tpu.memory_space<vmem>>, vector<1x8x32xbf16>
    %140 = vector.shape_cast %139 : vector<1x8x32xbf16> to vector<8x32xbf16>
    %cst_51 = arith.constant dense<0.000000e+00> : vector<8x32xf32>
    %141 = tpu.matmul %138, %140, %cst_51 {dimension_numbers = #tpu.dot_dimension_numbers<[1], [0], [0], [1], [0, 0, 1, 1], [], []>} : vector<8x8xbf16>, vector<8x32xbf16>, vector<8x32xf32> -> vector<8x32xf32>
    %142 = arith.addf %121, %141 : vector<8x32xf32>
    %143 = vector.extract_strided_slice %31 {offsets = [8, 8], sizes = [8, 8], strides = [1, 1]} : vector<16x32xbf16> to vector<8x8xbf16>
    %144 = vector.extract_strided_slice %33 {offsets = [8, 8], sizes = [8, 8], strides = [1, 1]} : vector<16x32xbf16> to vector<8x8xbf16>
    %145 = vector.extract_strided_slice %35 {offsets = [8, 8], sizes = [8, 8], strides = [1, 1]} : vector<16x32xbf16> to vector<8x8xbf16>
    %cst_52 = arith.constant dense<0.000000e+00> : vector<8x8xf32>
    %146 = tpu.matmul %143, %144, %cst_52 {dimension_numbers = #tpu.dot_dimension_numbers<[1], [1], [0], [0], [0, 0, 1, 0], [], []>} : vector<8x8xbf16>, vector<8x8xbf16>, vector<8x8xf32> -> vector<8x8xf32>
    %cst_53 = arith.constant dense<0xFF800000> : vector<8xf32>
    %147 = vector.multi_reduction <maximumf>, %146, %cst_53 [1] : vector<8x8xf32> to vector<8xf32>
    %148 = vector.shape_cast %147 : vector<8xf32> to vector<8x1xf32>
    %149 = vector.broadcast %148 : vector<8x1xf32> to vector<8x8xf32>
    %150 = arith.subf %146, %149 : vector<8x8xf32>
    %151 = math.exp %150 : vector<8x8xf32>
    %cst_54 = arith.constant dense<0.000000e+00> : vector<8xf32>
    %152 = vector.multi_reduction <add>, %151, %cst_54 [1] : vector<8x8xf32> to vector<8xf32>
    %153 = vector.shape_cast %152 : vector<8xf32> to vector<8x1xf32>
    %154 = tpu.reciprocal %153 {approx = true} : vector<8x1xf32> -> vector<8x1xf32>
    %155 = vector.broadcast %154 : vector<8x1xf32> to vector<8x8xf32>
    %156 = arith.mulf %151, %155 : vector<8x8xf32>
    %157 = arith.truncf %156 : vector<8x8xf32> to vector<8x8xbf16>
    %cst_55 = arith.constant dense<0.000000e+00> : vector<8x8xf32>
    %158 = tpu.matmul %157, %145, %cst_55 {dimension_numbers = #tpu.dot_dimension_numbers<[1], [0], [0], [1], [0, 0, 1, 1], [], []>} : vector<8x8xbf16>, vector<8x8xbf16>, vector<8x8xf32> -> vector<8x8xf32>
    %159 = arith.truncf %158 : vector<8x8xf32> to vector<8x8xbf16>
    %c1_56 = arith.constant 1 : index
    %c0_57 = arith.constant 0 : index
    %c0_58 = arith.constant 0 : index
    %160 = vector.load %arg5[%c1_56, %c0_57, %c0_58] : memref<4x8x32xbf16, #tpu.memory_space<vmem>>, vector<1x8x32xbf16>
    %161 = vector.shape_cast %160 : vector<1x8x32xbf16> to vector<8x32xbf16>
    %cst_59 = arith.constant dense<0.000000e+00> : vector<8x32xf32>
    %162 = tpu.matmul %159, %161, %cst_59 {dimension_numbers = #tpu.dot_dimension_numbers<[1], [0], [0], [1], [0, 0, 1, 1], [], []>} : vector<8x8xbf16>, vector<8x32xbf16>, vector<8x32xf32> -> vector<8x32xf32>
    %163 = arith.addf %142, %162 : vector<8x32xf32>
    %164 = vector.extract_strided_slice %31 {offsets = [8, 16], sizes = [8, 8], strides = [1, 1]} : vector<16x32xbf16> to vector<8x8xbf16>
    %165 = vector.extract_strided_slice %33 {offsets = [8, 16], sizes = [8, 8], strides = [1, 1]} : vector<16x32xbf16> to vector<8x8xbf16>
    %166 = vector.extract_strided_slice %35 {offsets = [8, 16], sizes = [8, 8], strides = [1, 1]} : vector<16x32xbf16> to vector<8x8xbf16>
    %cst_60 = arith.constant dense<0.000000e+00> : vector<8x8xf32>
    %167 = tpu.matmul %164, %165, %cst_60 {dimension_numbers = #tpu.dot_dimension_numbers<[1], [1], [0], [0], [0, 0, 1, 0], [], []>} : vector<8x8xbf16>, vector<8x8xbf16>, vector<8x8xf32> -> vector<8x8xf32>
    %cst_61 = arith.constant dense<0xFF800000> : vector<8xf32>
    %168 = vector.multi_reduction <maximumf>, %167, %cst_61 [1] : vector<8x8xf32> to vector<8xf32>
    %169 = vector.shape_cast %168 : vector<8xf32> to vector<8x1xf32>
    %170 = vector.broadcast %169 : vector<8x1xf32> to vector<8x8xf32>
    %171 = arith.subf %167, %170 : vector<8x8xf32>
    %172 = math.exp %171 : vector<8x8xf32>
    %cst_62 = arith.constant dense<0.000000e+00> : vector<8xf32>
    %173 = vector.multi_reduction <add>, %172, %cst_62 [1] : vector<8x8xf32> to vector<8xf32>
    %174 = vector.shape_cast %173 : vector<8xf32> to vector<8x1xf32>
    %175 = tpu.reciprocal %174 {approx = true} : vector<8x1xf32> -> vector<8x1xf32>
    %176 = vector.broadcast %175 : vector<8x1xf32> to vector<8x8xf32>
    %177 = arith.mulf %172, %176 : vector<8x8xf32>
    %178 = arith.truncf %177 : vector<8x8xf32> to vector<8x8xbf16>
    %cst_63 = arith.constant dense<0.000000e+00> : vector<8x8xf32>
    %179 = tpu.matmul %178, %166, %cst_63 {dimension_numbers = #tpu.dot_dimension_numbers<[1], [0], [0], [1], [0, 0, 1, 1], [], []>} : vector<8x8xbf16>, vector<8x8xbf16>, vector<8x8xf32> -> vector<8x8xf32>
    %180 = arith.truncf %179 : vector<8x8xf32> to vector<8x8xbf16>
    %c2_64 = arith.constant 2 : index
    %c0_65 = arith.constant 0 : index
    %c0_66 = arith.constant 0 : index
    %181 = vector.load %arg5[%c2_64, %c0_65, %c0_66] : memref<4x8x32xbf16, #tpu.memory_space<vmem>>, vector<1x8x32xbf16>
    %182 = vector.shape_cast %181 : vector<1x8x32xbf16> to vector<8x32xbf16>
    %cst_67 = arith.constant dense<0.000000e+00> : vector<8x32xf32>
    %183 = tpu.matmul %180, %182, %cst_67 {dimension_numbers = #tpu.dot_dimension_numbers<[1], [0], [0], [1], [0, 0, 1, 1], [], []>} : vector<8x8xbf16>, vector<8x32xbf16>, vector<8x32xf32> -> vector<8x32xf32>
    %184 = arith.addf %163, %183 : vector<8x32xf32>
    %185 = vector.extract_strided_slice %31 {offsets = [8, 24], sizes = [8, 8], strides = [1, 1]} : vector<16x32xbf16> to vector<8x8xbf16>
    %186 = vector.extract_strided_slice %33 {offsets = [8, 24], sizes = [8, 8], strides = [1, 1]} : vector<16x32xbf16> to vector<8x8xbf16>
    %187 = vector.extract_strided_slice %35 {offsets = [8, 24], sizes = [8, 8], strides = [1, 1]} : vector<16x32xbf16> to vector<8x8xbf16>
    %cst_68 = arith.constant dense<0.000000e+00> : vector<8x8xf32>
    %188 = tpu.matmul %185, %186, %cst_68 {dimension_numbers = #tpu.dot_dimension_numbers<[1], [1], [0], [0], [0, 0, 1, 0], [], []>} : vector<8x8xbf16>, vector<8x8xbf16>, vector<8x8xf32> -> vector<8x8xf32>
    %cst_69 = arith.constant dense<0xFF800000> : vector<8xf32>
    %189 = vector.multi_reduction <maximumf>, %188, %cst_69 [1] : vector<8x8xf32> to vector<8xf32>
    %190 = vector.shape_cast %189 : vector<8xf32> to vector<8x1xf32>
    %191 = vector.broadcast %190 : vector<8x1xf32> to vector<8x8xf32>
    %192 = arith.subf %188, %191 : vector<8x8xf32>
    %193 = math.exp %192 : vector<8x8xf32>
    %cst_70 = arith.constant dense<0.000000e+00> : vector<8xf32>
    %194 = vector.multi_reduction <add>, %193, %cst_70 [1] : vector<8x8xf32> to vector<8xf32>
    %195 = vector.shape_cast %194 : vector<8xf32> to vector<8x1xf32>
    %196 = tpu.reciprocal %195 {approx = true} : vector<8x1xf32> -> vector<8x1xf32>
    %197 = vector.broadcast %196 : vector<8x1xf32> to vector<8x8xf32>
    %198 = arith.mulf %193, %197 : vector<8x8xf32>
    %199 = arith.truncf %198 : vector<8x8xf32> to vector<8x8xbf16>
    %cst_71 = arith.constant dense<0.000000e+00> : vector<8x8xf32>
    %200 = tpu.matmul %199, %187, %cst_71 {dimension_numbers = #tpu.dot_dimension_numbers<[1], [0], [0], [1], [0, 0, 1, 1], [], []>} : vector<8x8xbf16>, vector<8x8xbf16>, vector<8x8xf32> -> vector<8x8xf32>
    %201 = arith.truncf %200 : vector<8x8xf32> to vector<8x8xbf16>
    %c3_72 = arith.constant 3 : index
    %c0_73 = arith.constant 0 : index
    %c0_74 = arith.constant 0 : index
    %202 = vector.load %arg5[%c3_72, %c0_73, %c0_74] : memref<4x8x32xbf16, #tpu.memory_space<vmem>>, vector<1x8x32xbf16>
    %203 = vector.shape_cast %202 : vector<1x8x32xbf16> to vector<8x32xbf16>
    %cst_75 = arith.constant dense<0.000000e+00> : vector<8x32xf32>
    %204 = tpu.matmul %201, %203, %cst_75 {dimension_numbers = #tpu.dot_dimension_numbers<[1], [0], [0], [1], [0, 0, 1, 1], [], []>} : vector<8x8xbf16>, vector<8x32xbf16>, vector<8x32xf32> -> vector<8x32xf32>
    %205 = arith.addf %184, %204 : vector<8x32xf32>
    %206 = tpu.concatenate %120, %205 in 0 : vector<8x32xf32>, vector<8x32xf32> -> vector<16x32xf32>
    %207 = arith.addf %0, %206 : vector<16x32xf32>
    %c0_76 = arith.constant 0 : index
    %c0_77 = arith.constant 0 : index
    %208 = vector.load %arg6[%c0_76, %c0_77] : memref<1x32xf32, #tpu.memory_space<vmem>>, vector<1x32xf32>
    %209 = vector.broadcast %208 : vector<1x32xf32> to vector<16x32xf32>
    %210 = arith.addf %207, %209 : vector<16x32xf32>
    %c0_78 = arith.constant 0 : index
    %c0_79 = arith.constant 0 : index
    %211 = vector.load %arg7[%c0_78, %c0_79] : memref<1x32xf32, #tpu.memory_space<vmem>>, vector<1x32xf32>
    %c0_80 = arith.constant 0 : index
    %c0_81 = arith.constant 0 : index
    %212 = vector.load %arg8[%c0_80, %c0_81] : memref<1x32xf32, #tpu.memory_space<vmem>>, vector<1x32xf32>
    %cst_82 = arith.constant dense<0.000000e+00> : vector<16xf32>
    %213 = vector.multi_reduction <add>, %210, %cst_82 [1] : vector<16x32xf32> to vector<16xf32>
    %214 = vector.shape_cast %213 : vector<16xf32> to vector<16x1xf32>
    %cst_83 = arith.constant 3.200000e+01 : f32
    %215 = vector.broadcast %cst_83 : f32 to vector<16x1xf32>
    %216 = arith.divf %214, %215 : vector<16x1xf32>
    %217 = vector.broadcast %216 : vector<16x1xf32> to vector<16x32xf32>
    %218 = arith.subf %210, %217 : vector<16x32xf32>
    %219 = arith.mulf %218, %218 : vector<16x32xf32>
    %cst_84 = arith.constant dense<0.000000e+00> : vector<16xf32>
    %220 = vector.multi_reduction <add>, %219, %cst_84 [1] : vector<16x32xf32> to vector<16xf32>
    %221 = vector.shape_cast %220 : vector<16xf32> to vector<16x1xf32>
    %cst_85 = arith.constant 3.200000e+01 : f32
    %222 = vector.broadcast %cst_85 : f32 to vector<16x1xf32>
    %223 = arith.divf %221, %222 : vector<16x1xf32>
    %224 = vector.broadcast %216 : vector<16x1xf32> to vector<16x32xf32>
    %225 = arith.subf %210, %224 : vector<16x32xf32>
    %cst_86 = arith.constant 9.99999974E-6 : f32
    %226 = vector.broadcast %cst_86 : f32 to vector<16x1xf32>
    %227 = arith.addf %223, %226 : vector<16x1xf32>
    %228 = math.rsqrt %227 : vector<16x1xf32>
    %229 = vector.broadcast %228 : vector<16x1xf32> to vector<16x32xf32>
    %230 = arith.mulf %225, %229 : vector<16x32xf32>
    %231 = vector.broadcast %211 : vector<1x32xf32> to vector<16x32xf32>
    %232 = arith.mulf %230, %231 : vector<16x32xf32>
    %233 = vector.broadcast %212 : vector<1x32xf32> to vector<16x32xf32>
    %234 = arith.addf %232, %233 : vector<16x32xf32>
    %235 = arith.truncf %234 : vector<16x32xf32> to vector<16x32xbf16>
    %c0_87 = arith.constant 0 : index
    %c0_88 = arith.constant 0 : index
    %236 = vector.load %arg9[%c0_87, %c0_88] : memref<32x128xbf16, #tpu.memory_space<vmem>>, vector<32x128xbf16>
    %cst_89 = arith.constant dense<0.000000e+00> : vector<16x128xf32>
    %237 = tpu.matmul %235, %236, %cst_89 {dimension_numbers = #tpu.dot_dimension_numbers<[1], [0], [0], [1], [0, 0, 1, 1], [], []>} : vector<16x32xbf16>, vector<32x128xbf16>, vector<16x128xf32> -> vector<16x128xf32>
    %c0_90 = arith.constant 0 : index
    %c0_91 = arith.constant 0 : index
    %238 = vector.load %arg10[%c0_90, %c0_91] : memref<1x128xf32, #tpu.memory_space<vmem>>, vector<1x128xf32>
    %239 = vector.broadcast %238 : vector<1x128xf32> to vector<16x128xf32>
    %240 = arith.addf %237, %239 : vector<16x128xf32>
    %cst_92 = arith.constant 5.000000e-01 : f32
    %241 = vector.broadcast %cst_92 : f32 to vector<16x128xf32>
    %242 = arith.mulf %241, %240 : vector<16x128xf32>
    %cst_93 = arith.constant 0.707106769 : f32
    %243 = vector.broadcast %cst_93 : f32 to vector<16x128xf32>
    %244 = arith.mulf %240, %243 : vector<16x128xf32>
    %245 = math.erf %244 : vector<16x128xf32>
    %cst_94 = arith.constant 1.000000e+00 : f32
    %246 = vector.broadcast %cst_94 : f32 to vector<16x128xf32>
    %247 = arith.addf %246, %245 : vector<16x128xf32>
    %248 = arith.mulf %242, %247 : vector<16x128xf32>
    %249 = arith.truncf %248 : vector<16x128xf32> to vector<16x128xbf16>
    %c0_95 = arith.constant 0 : index
    %c0_96 = arith.constant 0 : index
    %250 = vector.load %arg11[%c0_95, %c0_96] : memref<128x32xbf16, #tpu.memory_space<vmem>>, vector<128x32xbf16>
    %cst_97 = arith.constant dense<0.000000e+00> : vector<16x32xf32>
    %251 = tpu.matmul %249, %250, %cst_97 {dimension_numbers = #tpu.dot_dimension_numbers<[1], [0], [0], [1], [0, 0, 1, 1], [], []>} : vector<16x128xbf16>, vector<128x32xbf16>, vector<16x32xf32> -> vector<16x32xf32>
    %c0_98 = arith.constant 0 : index
    %c0_99 = arith.constant 0 : index
    %252 = vector.load %arg12[%c0_98, %c0_99] : memref<1x32xf32, #tpu.memory_space<vmem>>, vector<1x32xf32>
    %253 = vector.broadcast %252 : vector<1x32xf32> to vector<16x32xf32>
    %254 = arith.addf %251, %253 : vector<16x32xf32>
    %255 = arith.addf %210, %254 : vector<16x32xf32>
    %c0_100 = arith.constant 0 : index
    %c0_101 = arith.constant 0 : index
    %256 = vector.load %arg13[%c0_100, %c0_101] : memref<16x32xf32, #tpu.memory_space<vmem>>, vector<16x32xf32>
    tpu.vector_store %arg13[%c0_100, %c0_101], %255 {strides = array<i32>} : memref<16x32xf32, #tpu.memory_space<vmem>>, vector<16x32xf32>,
    return
  }
  func.func @transform_0(%arg0: i32) -> (i32, i32) {
    %c0_i32 = arith.constant 0 : i32
    %c0_i32_0 = arith.constant 0 : i32
    return %arg0, %c0_i32 : i32, i32
  }
  func.func @transform_1(%arg0: i32) -> (i32, i32) {
    %c0_i32 = arith.constant 0 : i32
    %c0_i32_0 = arith.constant 0 : i32
    %c0_i32_1 = arith.constant 0 : i32
    return %c0_i32, %c0_i32_0 : i32, i32
  }
  func.func @transform_2(%arg0: i32) -> (i32, i32) {
    %c0_i32 = arith.constant 0 : i32
    %c0_i32_0 = arith.constant 0 : i32
    %c0_i32_1 = arith.constant 0 : i32
    return %c0_i32, %c0_i32_0 : i32, i32
  }
  func.func @transform_3(%arg0: i32) -> (i32, i32) {
    %c0_i32 = arith.constant 0 : i32
    %c0_i32_0 = arith.constant 0 : i32
    %c0_i32_1 = arith.constant 0 : i32
    return %c0_i32, %c0_i32_0 : i32, i32
  }
  func.func @transform_4(%arg0: i32) -> (i32, i32, i32) {
    %c0_i32 = arith.constant 0 : i32
    %c0_i32_0 = arith.constant 0 : i32
    %c0_i32_1 = arith.constant 0 : i32
    %c0_i32_2 = arith.constant 0 : i32
    return %c0_i32, %c0_i32_0, %c0_i32_1 : i32, i32, i32
  }
  func.func @transform_5(%arg0: i32) -> (i32, i32) {
    %c0_i32 = arith.constant 0 : i32
    %c0_i32_0 = arith.constant 0 : i32
    %c0_i32_1 = arith.constant 0 : i32
    return %c0_i32, %c0_i32_0 : i32, i32
  }
  func.func @transform_6(%arg0: i32) -> (i32, i32) {
    %c0_i32 = arith.constant 0 : i32
    %c0_i32_0 = arith.constant 0 : i32
    %c0_i32_1 = arith.constant 0 : i32
    return %c0_i32, %c0_i32_0 : i32, i32
  }
  func.func @transform_7(%arg0: i32) -> (i32, i32) {
    %c0_i32 = arith.constant 0 : i32
    %c0_i32_0 = arith.constant 0 : i32
    %c0_i32_1 = arith.constant 0 : i32
    return %c0_i32, %c0_i32_0 : i32, i32
  }
  func.func @transform_8(%arg0: i32) -> (i32, i32) {
    %c0_i32 = arith.constant 0 : i32
    %c0_i32_0 = arith.constant 0 : i32
    %c0_i32_1 = arith.constant 0 : i32
    return %c0_i32, %c0_i32_0 : i32, i32
  }
  func.func @transform_9(%arg0: i32) -> (i32, i32) {
    %c0_i32 = arith.constant 0 : i32
    %c0_i32_0 = arith.constant 0 : i32
    %c0_i32_1 = arith.constant 0 : i32
    return %c0_i32, %c0_i32_0 : i32, i32
  }
  func.func @transform_10(%arg0: i32) -> (i32, i32) {
    %c0_i32 = arith.constant 0 : i32
    %c0_i32_0 = arith.constant 0 : i32
    %c0_i32_1 = arith.constant 0 : i32
    return %c0_i32, %c0_i32_0 : i32, i32
  }
  func.func @transform_11(%arg0: i32) -> (i32, i32) {
    %c0_i32 = arith.constant 0 : i32
    %c0_i32_0 = arith.constant 0 : i32
    %c0_i32_1 = arith.constant 0 : i32
    return %c0_i32, %c0_i32_0 : i32, i32
  }
  func.func @transform_12(%arg0: i32) -> (i32, i32) {
    %c0_i32 = arith.constant 0 : i32
    %c0_i32_0 = arith.constant 0 : i32
    return %arg0, %c0_i32 : i32, i32
  }
}

</mosaic_0001>

<bundles_post_ra>
// kernel: tpu_custom_call.1
= control target key start
LH: loop header
LB: loop body
LE: loop exit
PB: predicated region body
PF: predicated region fallthrough
CT: control target
= control target key end

     0   :  { %vm47_vm0 = vcmask 261120   ;;  %s2492_s0 = inlined_call_operand.vmem [shape: f32[16,32], index: 0, kind: input, shape index: {}]   ;;  %s2493_s1 = inlined_call_operand.vmem [shape: f32[1,32], index: 1, kind: input, shape index: {}]   ;;  %s2494_s2 = inlined_call_operand.vmem [shape: f32[1,32], index: 2, kind: input, shape index: {}]   ;;  %s2495_s3 = inlined_call_operand.vmem [shape: bf16[32,96], index: 3, kind: input, shape index: {}]   ;;  %s2496_s4 = inlined_call_operand.vmem [shape: bf16[4,8,32], index: 4, kind: input, shape index: {}]   ;;  %s2497_s5 = inlined_call_operand.vmem [shape: f32[1,32], index: 5, kind: input, shape index: {}]   ;;  %s2498_s6 = inlined_call_operand.vmem [shape: f32[1,32], index: 6, kind: input, shape index: {}]   ;;  %s2499_s7 = inlined_call_operand.vmem [shape: f32[1,32], index: 7, kind: input, shape index: {}]   ;;  %s2500_s8 = inlined_call_operand.vmem [shape: bf16[32,128], index: 8, kind: input, shape index: {}]   ;;  %s2501_s9 = inlined_call_operand.vmem [shape: f32[1,128], index: 9, kind: input, shape index: {}]   ;;  %s2502_s10 = inlined_call_operand.vmem [shape: bf16[128,32], index: 10, kind: input, shape index: {}]   ;;  %s2503_s11 = inlined_call_operand.vmem [shape: f32[1,32], index: 11, kind: input, shape index: {}]   ;;  %s2504_s12 = inlined_call_operand.hbm [shape: f32[16,32], index: 12, kind: output, shape index: {}]  }
   0x1   :  { %v2148_v0 = vld [vmem:[%s2492_s0] sm:$0xff]  ;;  %v2153_v1 = vld [vmem:[%s2492_s0 + $0x8] sm:$0xff] }
   0x2   :  { %v48_v2 = vsel %vm47_vm0, %v2148_v0, 0.0  ;;  %v51_v3 = vsel %vm47_vm0, %v2153_v1, 0.0 }
   0x3   :  { %49 = vadd.xlane.f32.xlu0 %v48_v2 }
   0x7   :  { %52 = vadd.xlane.f32.xlu0 %v51_v3 }
   0x8   :  { %17 = vsyncpa [#allocation3], 0  ;;  %v1986_v14 = vld [vmem:[%s2495_s3 + $0x8] sm:$0xff]   ;;  %v2064_v15 = vmov 0.0   ;;  %vm2065_vm1 = vmmov 0   ;;  %v1987_v16 = vld [vmem:[%s2495_s3] sm:$0xff]  }
   0x9   :  { %1790 = vmatprep.subr.bf16.mxu1 %v2064_v15  ;;  %1794 = vmatprep.mubr.msk.bf16.mxu1 %vm2065_vm1, %v2064_v15  ;;  %v1679_v25 = vld [vmem:[%s2493_s1] ss:$0 sm:$0xff]  ;;  %s2066_s1 = smov 96   ;;  %vm159_vm2 = vcmask 64512   ;;  %s2068_s13 = smov 64   ;;  %vm223_vm3 = vcmask 1043456  }
   0xa   :  { %1791 = vmatpush3.bf16.msra.mxu1 %v1986_v14  ;;  %1816 = vmatprep.subr.bf16.mxu0 %v2064_v15  ;;  %v1680_v29 = vld [vmem:[%s2494_s2] ss:$0 sm:$0xff]  ;;  %s2067_s2 = smov 88   ;;  %s2069_s14 = smov 120  }
   0xb   :  { %1792 = vmatprep.subr.bf16.mxu1 %v2064_v15  ;;  %1818 = vmatprep.mubr.msk.bf16.mxu0 %vm2065_vm1, %v2064_v15  ;;  %s2070_s15 = smov 56   ;;  %s2071_s16 = smov 112  }
   0xc   :  { %s2072_s17 = smov 80   ;;  %s2073_s22 = smov 72  }
   0xd   :  { %s2074_s23 = smov 104   ;;  %s2075_s24 = smov 48  }
   0xe   :  { %1793 = vmatpush3.bf16.msra.mxu1 %v1987_v16  ;;  %s2076_s26 = smov 40   ;;  %s2077_s28 = smov [#allocation2]  }
   0xf   :  { %1798 = vmatprep.subr.bf16.mxu1 %v2064_v15 }
  0x8c   :  { %v50_v4 = vpop.xlane.xlu0 %49 }
  0x8d   :  { %v55_v5 = vmul.f32 0.03125, %v50_v4 }
  0x8f   :  { %v57_v6 = vsub.f32 %v2148_v0, %v55_v5 }
  0x90   :  { %v53_v7 = vpop.xlane.xlu0 %52 }
  0x91   :  { %v56_v8 = vmul.f32 0.03125, %v53_v7  ;;  %v59_v9 = vmul.f32 %v57_v6, %v57_v6 }
  0x93   :  { %v58_v10 = vsub.f32 %v2153_v1, %v56_v8  ;;  %v61_v11 = vsel %vm47_vm0, %v59_v9, 0.0 }
  0x94   :  { %62 = vadd.xlane.f32.xlu1 %v61_v11 }
  0x95   :  { %v60_v12 = vmul.f32 %v58_v10, %v58_v10 }
  0x97   :  { %v64_v13 = vsel %vm47_vm0, %v60_v12, 0.0 }
  0x98   :  { %65 = vadd.xlane.f32.xlu1 %v64_v13 }
 0x11d   :  { %v63_v17 = vpop.xlane.xlu1 %62 }
 0x11e   :  { %v67_v18 = vmul.f32 0.03125, %v63_v17 }
 0x120   :  { %v69_v19 = vadd.f32 1e-05, %v67_v18  ;;  %v1688_v18 = vld [vmem:[%s2496_s4 + $0x4] sm:$0xf] }
 0x121   :  { %v66_v20 = vpop.xlane.xlu1 %65 }
 0x122   :  { %1998 = vrsqrt.f32 %v69_v19  ;;  %v68_v21 = vmul.f32 0.03125, %v66_v20  ;;  %v2230_v19 = vsel %vm223_vm3, %v1688_v18, 0 }
 0x124   :  { %v70_v22 = vadd.f32 1e-05, %v68_v21 }
 0x126   :  { %2000 = vrsqrt.f32 %v70_v22  ;;  %v268_v22 = vld [vmem:[%s2496_s4] sm:$0xf] }
 0x12f   :  { %v1999_v23 = vpop.eup %1998 }
 0x130   :  { %v73_v24 = vmul.f32 %v1999_v23, %v57_v6 }
 0x132   :  { %v81_v28 = vmul.f32 %v1679_v25, %v73_v24 }
 0x133   :  { %v2001_v26 = vpop.eup %2000 }
 0x134   :  { %v74_v27 = vmul.f32 %v2001_v26, %v58_v10  ;;  %v89_v31 = vadd.f32 %v1680_v29, %v81_v28 }
 0x136   :  { %v82_v30 = vmul.f32 %v1679_v25, %v74_v27  ;;  %v2238_v25 = vsel %vm223_vm3, %v268_v22, 0 }
 0x138   :  { %v90_v32 = vadd.f32 %v1680_v29, %v82_v30 }
 0x13a   :  { %v91_v33 = vpack.c.bf16 %v90_v32, %v89_v31 }
 0x13c   :  { %1795 = vmatmul.mubr.msk.bf16.vlgmr.msra.gmra.mxu1 %vm47_vm0, %v91_v33 }
 0x13d   :  { %1800 = vmatprep.mubr.msk.bf16.mxu1 %vm2065_vm1, %v2064_v15 }
 0x1fc   :  { %v145_v34 = vpop.f32.mrf.mxu1 }
 0x1fd   :  { %v152_v37 = vmul.f32 0.35355338, %v145_v34 }
 0x1fe   :  { %v1796_v35 = vpop.f32.mrf.mxu1 }
 0x200   :  { %v148_v36 = vpop.f32.mrf.mxu1 }
 0x201   :  { %v153_v38 = vmul.f32 0.35355338, %v148_v36  ;;  %v2186_v39 = vpack.c.bf16 %v148_v36, %v145_v34 }
 0x202   :  { %v1797_v40 = vpop.f32.mrf.mxu1 }
 0x203   :  { %v2188_v41 = vpack.c.bf16 %v153_v38, %v152_v37  ;;  %157 = vrot.lane.b32.xlu0 %v2186_v39, %s2066_s1 }
 0x207   :  { %272 = vrot.lane.b32.xlu0 %v2186_v39, %s2067_s2 }
 0x275   :  { %v158_v42 = vpop.permute.xlu0 %157 }
 0x276   :  { %v164_v43 = vsel %vm159_vm2, %v158_v42, 0 }
 0x277   :  { %1799 = vmatpush3.bf16.xpose.msra.mxu1 %v164_v43 }
 0x278   :  { %1804 = vmatprep.subr.bf16.mxu1 %v2064_v15 }
 0x279   :  { %v273_v59 = vpop.permute.xlu0 %272 }
 0x27a   :  { %v278_v61 = vsel %vm159_vm2, %v273_v59, 0 }
 0x27e   :  { %1801 = vmatmul.mubr.msk.bf16.vlgmr.msra.gmra.mxu1 %vm159_vm2, %v2188_v41 }
 0x27f   :  { %1806 = vmatprep.mubr.msk.bf16.mxu1 %vm2065_vm1, %v2064_v15 }
 0x33e   :  { %v200_v44 = vpop.f32.mrf.mxu1 }
 0x33f   :  { %v206_v45 = vsel %vm159_vm2, %v200_v44, -inf }
 0x340   :  { %207 = vmax.xlane.f32.xlu1 %v206_v45  ;;  %v1802_v46 = vpop.f32.mrf.mxu1 }
 0x342   :  { %v203_v47 = vpop.f32.mrf.mxu1 }
 0x344   :  { %v1803_v48 = vpop.f32.mrf.mxu1 }
 0x3c9   :  { %v208_v49 = vpop.xlane.xlu1 %207 }
 0x3ca   :  { %v209_v50 = vsub.f32 %v200_v44, %v208_v49 }
 0x3cc   :  { %v210_v51 = vmul.f32 1.442695, %v209_v50 }
 0x3ce   :  { %2002 = vpow2.f32 %v210_v51 }
 0x3db   :  { %v2003_v52 = vpop.eup %2002 }
 0x3dc   :  { %v212_v53 = vsel %vm159_vm2, %v2003_v52, 0.0 }
 0x3dd   :  { %213 = vadd.xlane.f32.xlu1 %v212_v53 }
 0x3ee   :  { %218 = vrot.lane.b32.xlu1 %v2186_v39, %s2068_s13 }
 0x3f2   :  { %270 = vrot.lane.b32.xlu1 %v2188_v41, %s2069_s14 }
 0x466   :  { %v214_v54 = vpop.xlane.xlu1 %213 }
 0x467   :  { %2004 = vrcp.f32 %v214_v54 }
 0x46a   :  { %v219_v55 = vpop.permute.xlu1 %218 }
 0x46b   :  { %v225_v56 = vsel %vm223_vm3, %v219_v55, 0 }
 0x46c   :  { %1805 = vmatpush3.bf16.msra.mxu1 %v225_v56 }
 0x46d   :  { %1810 = vmatprep.subr.bf16.mxu1 %v2064_v15 }
 0x46e   :  { %v271_v62 = vpop.permute.xlu1 %270 }
 0x474   :  { %v2005_v57 = vpop.eup %2004 }
 0x475   :  { %v216_v58 = vmul.f32 %v2005_v57, %v2003_v52 }
 0x477   :  { %v217_v60 = vpack.c.bf16 %v216_v58, %v216_v58 }
 0x479   :  { %1807 = vmatmul.mubr.msk.bf16.vlgmr.msra.gmra.mxu1 %vm159_vm2, %v217_v60 }
 0x47a   :  { %1811 = vmatpush3.bf16.xpose.msra.mxu1 %v278_v61  ;;  %1812 = vmatprep.mubr.msk.bf16.mxu1 %vm2065_vm1, %v2064_v15 }
 0x47b   :  { %1822 = vmatprep.subr.bf16.mxu1 %v2064_v15 }
 0x481   :  { %1813 = vmatmul.mubr.msk.bf16.vlgmr.msra.gmra.mxu1 %vm159_vm2, %v271_v62 }
 0x482   :  { %1824 = vmatprep.mubr.msk.bf16.mxu1 %vm2065_vm1, %v2064_v15  ;;  %1823 = vmatpush3.bf16.msra.mxu1 %v2230_v19 }
 0x483   :  { %1834 = vmatprep.subr.bf16.mxu1 %v2064_v15 }
 0x539   :  { %v261_v63 = vpop.f32.mrf.mxu1 }
 0x53a   :  { %v267_v26 = vpack.c.bf16 %v261_v63, %v261_v63 }
 0x53b   :  { %v1808_v2 = vpop.f32.mrf.mxu1 }
 0x53c   :  { %v1693_v2 = vld [vmem:[%s2496_s4 + $0x8] sm:$0xf] }
 0x53d   :  { %v264_v3 = vpop.f32.mrf.mxu1 }
 0x53e   :  { %v2282_v3 = vsel %vm223_vm3, %v1693_v2, 0 }
 0x53f   :  { %v1809_v4 = vpop.f32.mrf.mxu1 }
 0x541   :  { %v314_v5 = vpop.f32.mrf.mxu1 }
 0x542   :  { %v320_v6 = vsel %vm159_vm2, %v314_v5, -inf }
 0x543   :  { %321 = vmax.xlane.f32.xlu0 %v320_v6  ;;  %v1814_v7 = vpop.f32.mrf.mxu1 }
 0x545   :  { %v317_v8 = vpop.f32.mrf.mxu1 }
 0x547   :  { %v1815_v9 = vpop.f32.mrf.mxu1 }
 0x559   :  { %332 = vrot.lane.b32.xlu0 %v2186_v39, %s2070_s15 }
 0x55d   :  { %475 = vrot.lane.b32.xlu0 %v2188_v41, %s2071_s16 }
 0x5cc   :  { %v322_v10 = vpop.xlane.xlu0 %321 }
 0x5cd   :  { %v323_v11 = vsub.f32 %v314_v5, %v322_v10 }
 0x5cf   :  { %v324_v12 = vmul.f32 1.442695, %v323_v11 }
 0x5d0   :  { %v333_v13 = vpop.permute.xlu0 %332 }
 0x5d1   :  { %2006 = vpow2.f32 %v324_v12  ;;  %v338_v14 = vsel %vm223_vm3, %v333_v13, 0 }
 0x5d2   :  { %1817 = vmatpush3.bf16.msra.mxu0 %v338_v14  ;;  %v2293_v14 = vrot.slane %v2186_v39, 4 }
 0x5d3   :  { %1828 = vmatprep.subr.bf16.mxu0 %v2064_v15 }
 0x5d4   :  { %v476_v35 = vpop.permute.xlu0 %475 }
 0x5de   :  { %v2007_v16 = vpop.eup %2006 }
 0x5df   :  { %v326_v17 = vsel %vm159_vm2, %v2007_v16, 0.0 }
 0x5e0   :  { %327 = vadd.xlane.f32.xlu1 %v326_v17 }
 0x5f1   :  { %477 = vrot.lane.b32.xlu1 %v2186_v39, %s2072_s17 }
 0x669   :  { %v328_v20 = vpop.xlane.xlu1 %327 }
 0x66a   :  { %2008 = vrcp.f32 %v328_v20 }
 0x66d   :  { %v478_v27 = vpop.permute.xlu1 %477 }
 0x66e   :  { %v483_v31 = vsel %vm159_vm2, %v478_v27, 0 }
 0x677   :  { %v2009_v21 = vpop.eup %2008 }
 0x678   :  { %v330_v23 = vmul.f32 %v2009_v21, %v2007_v16 }
 0x67a   :  { %v331_v24 = vpack.c.bf16 %v330_v23, %v330_v23 }
 0x67c   :  { %1819 = vmatmul.mubr.msk.bf16.vlgmr.msra.gmra.mxu0 %vm159_vm2, %v331_v24 }
 0x67d   :  { %1829 = vmatpush3.bf16.msra.mxu0 %v2238_v25  ;;  %1830 = vmatprep.mubr.msk.bf16.mxu0 %vm2065_vm1, %v2064_v15 }
 0x67e   :  { %1840 = vmatprep.subr.bf16.mxu0 %v2064_v15 }
 0x684   :  { %1831 = vmatmul.mubr.msk.bf16.vlgmr.msra.gmra.mxu0 %vm159_vm2, %v267_v26 }
 0x685   :  { %1842 = vmatprep.mubr.msk.bf16.mxu0 %vm2065_vm1, %v2064_v15 }
 0x73c   :  { %v374_v28 = vpop.f32.mrf.mxu0 }
 0x73d   :  { %v380_v29 = vpack.c.bf16 %v374_v28, %v374_v28 }
 0x73e   :  { %v1820_v30 = vpop.f32.mrf.mxu0 }
 0x73f   :  { %1825 = vmatmul.mubr.msk.bf16.vlgmr.msra.gmra.mxu1 %vm159_vm2, %v380_v29 }
 0x740   :  { %1835 = vmatpush3.bf16.xpose.msra.mxu1 %v483_v31  ;;  %v377_v32 = vpop.f32.mrf.mxu0  ;;  %1836 = vmatprep.mubr.msk.bf16.mxu1 %vm2065_vm1, %v2064_v15 }
 0x741   :  { %1846 = vmatprep.subr.bf16.mxu1 %v2064_v15 }
 0x742   :  { %v1821_v33 = vpop.f32.mrf.mxu0 }
 0x744   :  { %v2253_v34 = vpop.f32.mrf.mxu0 }
 0x746   :  { %v1832_v36 = vpop.f32.mrf.mxu0 }
 0x747   :  { %1837 = vmatmul.mubr.msk.bf16.vlgmr.msra.gmra.mxu1 %vm159_vm2, %v476_v35 }
 0x748   :  { %v472_v37 = vpop.f32.mrf.mxu0  ;;  %1848 = vmatprep.mubr.msk.bf16.mxu1 %vm2065_vm1, %v2064_v15  ;;  %1847 = vmatpush3.bf16.msra.mxu1 %v2282_v3 }
 0x749   :  { %1858 = vmatprep.subr.bf16.mxu1 %v2064_v15 }
 0x74a   :  { %v1833_v38 = vpop.f32.mrf.mxu0 }
 0x7ff   :  { %v2258_v40 = vpop.f32.mrf.mxu1 }
 0x800   :  { %v470_v24 = vadd.f32 %v2253_v34, %v2258_v40  ;;  %v1697_v40 = vld [vmem:[%s2496_s4 + $0xc] sm:$0xf] }
 0x801   :  { %v1826_v42 = vpop.f32.mrf.mxu1 }
 0x802   :  { %v2331_v42 = vsel %vm223_vm3, %v1697_v40, 0 }
 0x803   :  { %v426_v43 = vpop.f32.mrf.mxu1 }
 0x805   :  { %v1827_v44 = vpop.f32.mrf.mxu1 }
 0x807   :  { %v519_v45 = vpop.f32.mrf.mxu1 }
 0x808   :  { %v525_v46 = vsel %vm159_vm2, %v519_v45, -inf }
 0x809   :  { %526 = vmax.xlane.f32.xlu1 %v525_v46  ;;  %v1838_v47 = vpop.f32.mrf.mxu1 }
 0x80b   :  { %v522_v48 = vpop.f32.mrf.mxu1 }
 0x80d   :  { %v1839_v49 = vpop.f32.mrf.mxu1 }
 0x81a   :  { %637 = vrot.lane.b32.xlu1 %v2186_v39, %s2073_s22 }
 0x81e   :  { %635 = vrot.lane.b32.xlu1 %v2188_v41, %s2074_s23 }
 0x892   :  { %v527_v50 = vpop.xlane.xlu1 %526 }
 0x893   :  { %v528_v51 = vsub.f32 %v519_v45, %v527_v50 }
 0x895   :  { %v529_v52 = vmul.f32 1.442695, %v528_v51 }
 0x896   :  { %v638_v60 = vpop.permute.xlu1 %637 }
 0x897   :  { %2010 = vpow2.f32 %v529_v52  ;;  %v643_v62 = vsel %vm159_vm2, %v638_v60, 0 }
 0x89a   :  { %v636_v63 = vpop.permute.xlu1 %635 }
 0x8a4   :  { %v2011_v53 = vpop.eup %2010 }
 0x8a5   :  { %v531_v54 = vsel %vm159_vm2, %v2011_v53, 0.0 }
 0x8a6   :  { %532 = vadd.xlane.f32.xlu0 %v531_v54 }
 0x8bc   :  { %537 = vrot.lane.b32.xlu0 %v2186_v39, %s2075_s24 }
 0x92f   :  { %v533_v55 = vpop.xlane.xlu0 %532 }
 0x930   :  { %2012 = vrcp.f32 %v533_v55 }
 0x933   :  { %v538_v56 = vpop.permute.xlu0 %537 }
 0x934   :  { %v543_v57 = vsel %vm223_vm3, %v538_v56, 0 }
 0x935   :  { %1841 = vmatpush3.bf16.msra.mxu0 %v543_v57 }
 0x936   :  { %1852 = vmatprep.subr.bf16.mxu0 %v2064_v15 }
 0x93d   :  { %v2013_v58 = vpop.eup %2012 }
 0x93e   :  { %v535_v59 = vmul.f32 %v2013_v58, %v2011_v53 }
 0x940   :  { %v536_v61 = vpack.c.bf16 %v535_v59, %v535_v59 }
 0x942   :  { %1843 = vmatmul.mubr.msk.bf16.vlgmr.msra.gmra.mxu0 %vm159_vm2, %v536_v61 }
 0x943   :  { %1853 = vmatpush3.bf16.xpose.msra.mxu0 %v643_v62  ;;  %1854 = vmatprep.mubr.msk.bf16.mxu0 %vm2065_vm1, %v2064_v15 }
 0x944   :  { %1864 = vmatprep.subr.bf16.mxu0 %v2064_v15 }
 0x94a   :  { %1855 = vmatmul.mubr.msk.bf16.vlgmr.msra.gmra.mxu0 %vm159_vm2, %v636_v63 }
 0x94b   :  { %1866 = vmatprep.mubr.msk.bf16.mxu0 %vm2065_vm1, %v2064_v15  ;;  %1865 = vmatpush3.bf16.msra.mxu0 %v2331_v42 }
 0x94c   :  { %1876 = vmatprep.subr.bf16.mxu0 %v2064_v15 }
 0xa02   :  { %v579_v4 = vpop.f32.mrf.mxu0 }
 0xa03   :  { %v585_v5 = vpack.c.bf16 %v579_v4, %v579_v4 }
 0xa04   :  { %v1844_v6 = vpop.f32.mrf.mxu0 }
 0xa05   :  { %1849 = vmatmul.mubr.msk.bf16.vlgmr.msra.gmra.mxu1 %vm159_vm2, %v585_v5 }
 0xa06   :  { %v582_v7 = vpop.f32.mrf.mxu0  ;;  %1860 = vmatprep.mubr.msk.bf16.mxu1 %vm2065_vm1, %v2064_v15 }
 0xa08   :  { %v1845_v8 = vpop.f32.mrf.mxu0 }
 0xa0a   :  { %v679_v9 = vpop.f32.mrf.mxu0 }
 0xa0b   :  { %v685_v10 = vsel %vm159_vm2, %v679_v9, -inf }
 0xa0c   :  { %686 = vmax.xlane.f32.xlu0 %v685_v10  ;;  %v1856_v11 = vpop.f32.mrf.mxu0 }
 0xa0e   :  { %v682_v12 = vpop.f32.mrf.mxu0 }
 0xa10   :  { %v1857_v13 = vpop.f32.mrf.mxu0 }
 0xa22   :  { %697 = vrot.lane.b32.xlu0 %v2186_v39, %s2076_s26  ;;  %v2303_v39 = vrot.slane %v2188_v41, 4 }
 0xa26   :  { %908 = vrot.lane.b32.xlu0 %v2293_v14, %s2067_s2 }
 0xa95   :  { %v687_v16 = vpop.xlane.xlu0 %686 }
 0xa96   :  { %v688_v17 = vsub.f32 %v679_v9, %v687_v16 }
 0xa98   :  { %v689_v18 = vmul.f32 1.442695, %v688_v17 }
 0xa99   :  { %v698_v20 = vpop.permute.xlu0 %697 }
 0xa9a   :  { %2014 = vpow2.f32 %v689_v18  ;;  %v703_v21 = vsel %vm223_vm3, %v698_v20, 0 }
 0xa9b   :  { %1859 = vmatpush3.bf16.msra.mxu1 %v703_v21 }
 0xa9c   :  { %1870 = vmatprep.subr.bf16.mxu1 %v2064_v15 }
 0xa9d   :  { %v909_v34 = vpop.permute.xlu0 %908 }
 0xa9e   :  { %v914_v37 = vsel %vm159_vm2, %v909_v34, 0 }
 0xaa7   :  { %v2015_v22 = vpop.eup %2014 }
 0xaa8   :  { %v691_v23 = vsel %vm159_vm2, %v2015_v22, 0.0 }
 0xaa9   :  { %692 = vadd.xlane.f32.xlu1 %v691_v23 }
 0xaba   :  { %797 = vrot.lane.b32.xlu1 %v2293_v14, %s2066_s1 }
 0xabe   :  { %906 = vrot.lane.b32.xlu1 %v2303_v39, %s2069_s14 }
 0xac5   :  { %v628_v26 = vpop.f32.mrf.mxu1 }
 0xac6   :  { %v2309_v27 = vadd.f32 %v628_v26, %v470_v24 }
 0xac7   :  { %v1850_v28 = vpop.f32.mrf.mxu1 }
 0xac9   :  { %v631_v29 = vpop.f32.mrf.mxu1 }
 0xacb   :  { %v1851_v30 = vpop.f32.mrf.mxu1 }
 0xb32   :  { %v693_v31 = vpop.xlane.xlu1 %692 }
 0xb33   :  { %2016 = vrcp.f32 %v693_v31 }
 0xb36   :  { %v798_v35 = vpop.permute.xlu1 %797 }
 0xb37   :  { %v803_v41 = vsel %vm159_vm2, %v798_v35, 0 }
 0xb3a   :  { %v907_v38 = vpop.permute.xlu1 %906 }
 0xb40   :  { %v2017_v32 = vpop.eup %2016 }
 0xb41   :  { %v695_v33 = vmul.f32 %v2017_v32, %v2015_v22 }
 0xb43   :  { %v696_v36 = vpack.c.bf16 %v695_v33, %v695_v33 }
 0xb45   :  { %1861 = vmatmul.mubr.msk.bf16.vlgmr.msra.gmra.mxu1 %vm159_vm2, %v696_v36 }
 0xb46   :  { %1871 = vmatpush3.bf16.xpose.msra.mxu1 %v803_v41  ;;  %1872 = vmatprep.mubr.msk.bf16.mxu1 %vm2065_vm1, %v2064_v15 }
 0xb47   :  { %1882 = vmatprep.subr.bf16.mxu1 %v2064_v15 }
 0xb4d   :  { %1873 = vmatmul.mubr.msk.bf16.vlgmr.msra.gmra.mxu1 %vm159_vm2, %v2303_v39 }
 0xb4e   :  { %1883 = vmatpush3.bf16.xpose.msra.mxu1 %v914_v37  ;;  %1884 = vmatprep.mubr.msk.bf16.mxu1 %vm2065_vm1, %v2064_v15 }
 0xb4f   :  { %1894 = vmatprep.subr.bf16.mxu1 %v2064_v15 }
 0xb55   :  { %1885 = vmatmul.mubr.msk.bf16.vlgmr.msra.gmra.mxu1 %vm159_vm2, %v907_v38 }
 0xb56   :  { %1895 = vmatpush3.bf16.msra.mxu1 %v2230_v19  ;;  %1896 = vmatprep.mubr.msk.bf16.mxu1 %vm2065_vm1, %v2064_v15 }
 0xb57   :  { %1906 = vmatprep.subr.bf16.mxu1 %v2064_v15 }
 0xc05   :  { %v739_v43 = vpop.f32.mrf.mxu1 }
 0xc06   :  { %v745_v44 = vpack.c.bf16 %v739_v43, %v739_v43 }
 0xc07   :  { %v1862_v45 = vpop.f32.mrf.mxu1 }
 0xc08   :  { %1867 = vmatmul.mubr.msk.bf16.vlgmr.msra.gmra.mxu0 %vm159_vm2, %v745_v44 }
 0xc09   :  { %v742_v19 = vpop.f32.mrf.mxu1  ;;  %1878 = vmatprep.mubr.msk.bf16.mxu0 %vm2065_vm1, %v2064_v15 }
 0xc0b   :  { %v1863_v46 = vpop.f32.mrf.mxu1 }
 0xc0d   :  { %v839_v47 = vpop.f32.mrf.mxu1 }
 0xc0e   :  { %v845_v48 = vsel %vm159_vm2, %v839_v47, -inf }
 0xc0f   :  { %846 = vmax.xlane.f32.xlu0 %v845_v48  ;;  %v1874_v49 = vpop.f32.mrf.mxu1 }
 0xc11   :  { %v842_v50 = vpop.f32.mrf.mxu1 }
 0xc13   :  { %v1875_v51 = vpop.f32.mrf.mxu1 }
 0xc15   :  { %v950_v52 = vpop.f32.mrf.mxu1 }
 0xc16   :  { %v956_v53 = vsel %vm159_vm2, %v950_v52, -inf }
 0xc17   :  { %957 = vmax.xlane.f32.xlu1 %v956_v53  ;;  %v1886_v54 = vpop.f32.mrf.mxu1 }
 0xc19   :  { %v953_v55 = vpop.f32.mrf.mxu1 }
 0xc1b   :  { %v1887_v56 = vpop.f32.mrf.mxu1 }
 0xc28   :  { %968 = vrot.lane.b32.xlu1 %v2293_v14, %s2070_s15 }
 0xc2c   :  { %1105 = vrot.lane.b32.xlu1 %v2293_v14, %s2072_s17 }
 0xc30   :  { %1103 = vrot.lane.b32.xlu1 %v2303_v39, %s2071_s16 }
 0xc98   :  { %v847_v57 = vpop.xlane.xlu0 %846 }
 0xc99   :  { %v848_v58 = vsub.f32 %v839_v47, %v847_v57 }
 0xc9b   :  { %v849_v59 = vmul.f32 1.442695, %v848_v58 }
 0xc9d   :  { %2018 = vpow2.f32 %v849_v59 }
 0xca0   :  { %v958_v60 = vpop.xlane.xlu1 %957 }
 0xca1   :  { %v959_v61 = vsub.f32 %v950_v52, %v958_v60 }
 0xca3   :  { %v960_v62 = vmul.f32 1.442695, %v959_v61 }
 0xca4   :  { %v969_v20 = vpop.permute.xlu1 %968 }
 0xca5   :  { %2020 = vpow2.f32 %v960_v62  ;;  %v974_v22 = vsel %vm223_vm3, %v969_v20, 0 }
 0xca8   :  { %v1106_v32 = vpop.permute.xlu1 %1105 }
 0xcaa   :  { %v2019_v63 = vpop.eup %2018 }
 0xcab   :  { %v851_v2 = vsel %vm159_vm2, %v2019_v63, 0.0 }
 0xcac   :  { %852 = vadd.xlane.f32.xlu0 %v851_v2  ;;  %v1104_v37 = vpop.permute.xlu1 %1103 }
 0xcb2   :  { %v2021_v4 = vpop.eup %2020 }
 0xcb3   :  { %v962_v5 = vsel %vm159_vm2, %v2021_v4, 0.0 }
 0xcb4   :  { %963 = vadd.xlane.f32.xlu0 %v962_v5 }
 0xcc8   :  { %v788_v6 = vpop.f32.mrf.mxu0 }
 0xcc9   :  { %v2349_v7 = vadd.f32 %v788_v6, %v2309_v27 }
 0xcca   :  { %v1868_v8 = vpop.f32.mrf.mxu0  ;;  %857 = vrot.lane.b32.xlu0 %v2293_v14, %s2068_s13 }
 0xccc   :  { %v791_v9 = vpop.f32.mrf.mxu0 }
 0xcce   :  { %v1869_v10 = vpop.f32.mrf.mxu0 }
 0xccf   :  { %v1413_v10 = vadd.f32 %v2349_v7, %v2148_v0 }
 0xd35   :  { %v853_v11 = vpop.xlane.xlu0 %852 }
 0xd36   :  { %2022 = vrcp.f32 %v853_v11 }
 0xd3d   :  { %v964_v12 = vpop.xlane.xlu0 %963 }
 0xd3e   :  { %2024 = vrcp.f32 %v964_v12 }
 0xd41   :  { %v858_v13 = vpop.permute.xlu0 %857 }
 0xd42   :  { %v863_v16 = vsel %vm223_vm3, %v858_v13, 0 }
 0xd43   :  { %v2023_v17 = vpop.eup %2022  ;;  %1877 = vmatpush3.bf16.msra.mxu0 %v863_v16 }
 0xd44   :  { %1888 = vmatprep.subr.bf16.mxu0 %v2064_v15  ;;  %v855_v18 = vmul.f32 %v2023_v17, %v2019_v63 }
 0xd46   :  { %v856_v21 = vpack.c.bf16 %v855_v18, %v855_v18 }
 0xd48   :  { %1879 = vmatmul.mubr.msk.bf16.vlgmr.msra.gmra.mxu0 %vm159_vm2, %v856_v21 }
 0xd49   :  { %1889 = vmatpush3.bf16.msra.mxu0 %v974_v22  ;;  %1890 = vmatprep.mubr.msk.bf16.mxu0 %vm2065_vm1, %v2064_v15 }
 0xd4a   :  { %1900 = vmatprep.subr.bf16.mxu0 %v2064_v15 }
 0xd4b   :  { %v2025_v23 = vpop.eup %2024 }
 0xd4c   :  { %v966_v24 = vmul.f32 %v2025_v23, %v2021_v4 }
 0xd4e   :  { %v967_v26 = vpack.c.bf16 %v966_v24, %v966_v24 }
 0xd50   :  { %1891 = vmatmul.mubr.msk.bf16.vlgmr.msra.gmra.mxu0 %vm159_vm2, %v967_v26 }
 0xd51   :  { %1901 = vmatpush3.bf16.msra.mxu0 %v2238_v25  ;;  %1902 = vmatprep.mubr.msk.bf16.mxu0 %vm2065_vm1, %v2064_v15  ;;  %v1111_v25 = vsel %vm159_vm2, %v1106_v32, 0 }
 0xd52   :  { %1912 = vmatprep.subr.bf16.mxu0 %v2064_v15 }
 0xe08   :  { %v899_v27 = vpop.f32.mrf.mxu0 }
 0xe09   :  { %v905_v28 = vpack.c.bf16 %v899_v27, %v899_v27 }
 0xe0a   :  { %v1880_v29 = vpop.f32.mrf.mxu0 }
 0xe0b   :  { %1903 = vmatmul.mubr.msk.bf16.vlgmr.msra.gmra.mxu0 %vm159_vm2, %v905_v28 }
 0xe0c   :  { %v902_v30 = vpop.f32.mrf.mxu0  ;;  %1914 = vmatprep.mubr.msk.bf16.mxu0 %vm2065_vm1, %v2064_v15 }
 0xe0e   :  { %v1881_v31 = vpop.f32.mrf.mxu0 }
 0xe10   :  { %v1010_v33 = vpop.f32.mrf.mxu0 }
 0xe11   :  { %v1016_v35 = vpack.c.bf16 %v1010_v33, %v1010_v33 }
 0xe12   :  { %v1892_v36 = vpop.f32.mrf.mxu0 }
 0xe13   :  { %1897 = vmatmul.mubr.msk.bf16.vlgmr.msra.gmra.mxu1 %vm159_vm2, %v1016_v35 }
 0xe14   :  { %1907 = vmatpush3.bf16.xpose.msra.mxu1 %v1111_v25  ;;  %v1013_v41 = vpop.f32.mrf.mxu0  ;;  %1908 = vmatprep.mubr.msk.bf16.mxu1 %vm2065_vm1, %v2064_v15 }
 0xe15   :  { %1918 = vmatprep.subr.bf16.mxu1 %v2064_v15 }
 0xe16   :  { %v1893_v34 = vpop.f32.mrf.mxu0 }
 0xe1b   :  { %1909 = vmatmul.mubr.msk.bf16.vlgmr.msra.gmra.mxu1 %vm159_vm2, %v1104_v37 }
 0xe1c   :  { %1919 = vmatpush3.bf16.msra.mxu1 %v2282_v3  ;;  %1920 = vmatprep.mubr.msk.bf16.mxu1 %vm2065_vm1, %v2064_v15 }
 0xe1d   :  { %1930 = vmatprep.subr.bf16.mxu1 %v2064_v15 }
 0xecb   :  { %v1097_v38 = vpop.f32.mrf.mxu0 }
 0xecd   :  { %v1904_v40 = vpop.f32.mrf.mxu0 }
 0xecf   :  { %v1100_v43 = vpop.f32.mrf.mxu0 }
 0xed1   :  { %v1905_v44 = vpop.f32.mrf.mxu0 }
 0xed3   :  { %v1054_v45 = vpop.f32.mrf.mxu1 }
 0xed4   :  { %v2378_v19 = vadd.f32 %v1097_v38, %v1054_v45 }
 0xed5   :  { %v1898_v46 = vpop.f32.mrf.mxu1 }
 0xed7   :  { %v1057_v47 = vpop.f32.mrf.mxu1 }
 0xed9   :  { %v1899_v48 = vpop.f32.mrf.mxu1 }
 0xedb   :  { %v1147_v49 = vpop.f32.mrf.mxu1 }
 0xedc   :  { %v1153_v50 = vsel %vm159_vm2, %v1147_v49, -inf }
 0xedd   :  { %1154 = vmax.xlane.f32.xlu0 %v1153_v50  ;;  %v1910_v3 = vpop.f32.mrf.mxu1 }
 0xedf   :  { %v1150_v51 = vpop.f32.mrf.mxu1 }
 0xee1   :  { %v1911_v52 = vpop.f32.mrf.mxu1 }
 0xef3   :  { %1165 = vrot.lane.b32.xlu0 %v2293_v14, %s2075_s24 }
 0xef7   :  { %1258 = vrot.lane.b32.xlu0 %v2303_v39, %s2074_s23 }
 0xf66   :  { %v1155_v53 = vpop.xlane.xlu0 %1154 }
 0xf67   :  { %v1156_v54 = vsub.f32 %v1147_v49, %v1155_v53 }
 0xf69   :  { %v1157_v55 = vmul.f32 1.442695, %v1156_v54 }
 0xf6a   :  { %v1166_v56 = vpop.permute.xlu0 %1165 }
 0xf6b   :  { %2026 = vpow2.f32 %v1157_v55  ;;  %v1171_v57 = vsel %vm223_vm3, %v1166_v56, 0 }
 0xf6c   :  { %1913 = vmatpush3.bf16.msra.mxu0 %v1171_v57 }
 0xf6d   :  { %1924 = vmatprep.subr.bf16.mxu0 %v2064_v15 }
 0xf6e   :  { %v1259_v4 = vpop.permute.xlu0 %1258 }
 0xf78   :  { %v2027_v58 = vpop.eup %2026 }
 0xf79   :  { %v1159_v59 = vsel %vm159_vm2, %v2027_v58, 0.0 }
 0xf7a   :  { %1160 = vadd.xlane.f32.xlu1 %v1159_v59  ;;  %v1990_v59 = vld [vmem:[%s2502_s10 + $0x38] sm:$0xff]  }
 0xf8b   :  { %1260 = vrot.lane.b32.xlu1 %v2293_v14, %s2073_s22 }
0x1003   :  { %v1161_v60 = vpop.xlane.xlu1 %1160 }
0x1004   :  { %2028 = vrcp.f32 %v1161_v60 }
0x1007   :  { %v1261_v62 = vpop.permute.xlu1 %1260 }
0x1008   :  { %v1266_v2 = vsel %vm159_vm2, %v1261_v62, 0 }
0x1011   :  { %v2029_v39 = vpop.eup %2028 }
0x1012   :  { %v1163_v61 = vmul.f32 %v2029_v39, %v2027_v58  ;;  %v1989_v58 = vld [vmem:[%s2500_s8] sm:$0xff]  }
0x1014   :  { %v1164_v63 = vpack.c.bf16 %v1163_v61, %v1163_v61 }
0x1016   :  { %1915 = vmatmul.mubr.msk.bf16.vlgmr.msra.gmra.mxu0 %vm159_vm2, %v1164_v63 }
0x1017   :  { %1925 = vmatpush3.bf16.xpose.msra.mxu0 %v1266_v2  ;;  %1926 = vmatprep.mubr.msk.bf16.mxu0 %vm2065_vm1, %v2064_v15 }
0x1018   :  { %1936 = vmatprep.subr.bf16.mxu0 %v2064_v15 }
0x101e   :  { %1927 = vmatmul.mubr.msk.bf16.vlgmr.msra.gmra.mxu0 %vm159_vm2, %v1259_v4 }
0x101f   :  { %1937 = vmatpush3.bf16.msra.mxu0 %v2331_v42  ;;  %1938 = vmatprep.mubr.msk.bf16.mxu0 %vm2065_vm1, %v2064_v15  ;;  %v1711_v42 = vld [vmem:[%s2497_s5] ss:$0 sm:$0xff]  ;;  %s1668_s5 = sshll.u32 %s2077_s28, 4  ;;  %s1669_s5 = int_to_ptr.vmem [resolvable:$true] %s1668_s5 }
0x1020   :  { %1950 = vmatprep.subr.bf16.mxu0 %v2064_v15  ;;  %v2408_v13 = vadd.f32 %v1711_v42, %v1413_v10  ;;  %s2042_s29 = scalar_lea.vmem %s1669_s5, 256  ;;  %p2047_p1 = scmp.lt.s32.totalorder %s1669_s5, %s1669_s5 }
0x1021   :  { %p2043_p0 = scmp.ne.s32.totalorder %s1669_s5, %s2042_s29  ;;  %p2048_p2 = scmp.lt.s32.totalorder %s2042_s29, %s2042_s29 }
0x1022   :  { %v1426_v20 = vsel %vm47_vm0, %v2408_v13, 0.0 }
0x1023   :  { %p2049_p3 = por %p2048_p2, %p2047_p1 }
0x1025   :  { %p2050_p4 = pnand %p2049_p3, %p2043_p0 }
0x10d6   :  { %v1207_v5 = vpop.f32.mrf.mxu0 }
0x10d7   :  { %v1213_v6 = vpack.c.bf16 %v1207_v5, %v1207_v5 }
0x10d8   :  { %v1916_v8 = vpop.f32.mrf.mxu0 }
0x10d9   :  { %1921 = vmatmul.mubr.msk.bf16.vlgmr.msra.gmra.mxu1 %vm159_vm2, %v1213_v6  ;;  %v1712_v6 = vld [vmem:[%s2498_s6] ss:$0 sm:$0xff] }
0x10da   :  { %v1210_v9 = vpop.f32.mrf.mxu0  ;;  %1932 = vmatprep.mubr.msk.bf16.mxu1 %vm2065_vm1, %v2064_v15 }
0x10dc   :  { %v1917_v11 = vpop.f32.mrf.mxu0 }
0x10de   :  { %v1302_v12 = vpop.f32.mrf.mxu0 }
0x10df   :  { %v1308_v16 = vsel %vm159_vm2, %v1302_v12, -inf }
0x10e0   :  { %1309 = vmax.xlane.f32.xlu1 %v1308_v16  ;;  %v1928_v17 = vpop.f32.mrf.mxu0 }
0x10e2   :  { %v1305_v18 = vpop.f32.mrf.mxu0 }
0x10e3   :  { %v1991_v18 = vld [vmem:[%s2502_s10 + $0x30] sm:$0xff]  }
0x10e4   :  { %1427 = vadd.xlane.f32.xlu1 %v1426_v20  ;;  %v1929_v21 = vpop.f32.mrf.mxu0  ;;  %v1992_v20 = vld [vmem:[%s2502_s10 + $0x28] sm:$0xff]  }
0x10e5   :  { %v1993_v21 = vld [vmem:[%s2502_s10 + $0x20] sm:$0xff]  }
0x1169   :  { %v1310_v22 = vpop.xlane.xlu1 %1309 }
0x116a   :  { %v1311_v0 = vsub.f32 %v1302_v12, %v1310_v22  ;;  %v1994_v22 = vld [vmem:[%s2502_s10 + $0x18] sm:$0xff]  }
0x116c   :  { %v1312_v7 = vmul.f32 1.442695, %v1311_v0  ;;  %v1995_v0 = vld [vmem:[%s2502_s10 + $0x10] sm:$0xff]  }
0x116d   :  { %v1428_v40 = vpop.xlane.xlu1 %1427 }
0x116e   :  { %2030 = vpow2.f32 %v1312_v7  ;;  %v1432_v43 = vmul.f32 0.03125, %v1428_v40  ;;  %v1996_v7 = vld [vmem:[%s2502_s10 + $0x8] sm:$0xff]   ;;  %v1718_v40 = vld [vmem:[%s2503_s11] ss:$0 sm:$0xff] }
0x1170   :  { %v1434_v46 = vsub.f32 %v2408_v13, %v1432_v43 }
0x1172   :  { %v1436_v51 = vmul.f32 %v1434_v46, %v1434_v46 }
0x1174   :  { %v1438_v52 = vsel %vm47_vm0, %v1436_v51, 0.0 }
0x117b   :  { %v2031_v23 = vpop.eup %2030 }
0x117c   :  { %v1314_v24 = vsel %vm159_vm2, %v2031_v23, 0.0 }
0x117d   :  { %1315 = vadd.xlane.f32.xlu0 %v1314_v24  ;;  %v1714_v24 = vld [vmem:[%s2501_s9] ss:$0 sm:$0xff] }
0x1193   :  { %1320 = vrot.lane.b32.xlu0 %v2293_v14, %s2076_s26 }
0x1199   :  { %v1251_v26 = vpop.f32.mrf.mxu1 }
0x119a   :  { %v1257_v27 = vadd.f32 %v1251_v26, %v2378_v19 }
0x119b   :  { %v1922_v28 = vpop.f32.mrf.mxu1 }
0x119d   :  { %v1254_v29 = vpop.f32.mrf.mxu1 }
0x119f   :  { %v1923_v30 = vpop.f32.mrf.mxu1 }
0x1206   :  { %v1316_v31 = vpop.xlane.xlu0 %1315 }
0x1207   :  { %2032 = vrcp.f32 %v1316_v31 }
0x120a   :  { %v1321_v32 = vpop.permute.xlu0 %1320 }
0x120b   :  { %v1326_v33 = vsel %vm223_vm3, %v1321_v32, 0 }
0x120c   :  { %1931 = vmatpush3.bf16.msra.mxu1 %v1326_v33 }
0x120d   :  { %1942 = vmatprep.subr.bf16.mxu1 %v2064_v15 }
0x1214   :  { %v2033_v35 = vpop.eup %2032 }
0x1215   :  { %v1318_v36 = vmul.f32 %v2033_v35, %v2031_v23  ;;  %v1997_v23 = vld [vmem:[%s2502_s10] sm:$0xff]  }
0x1217   :  { %v1319_v25 = vpack.c.bf16 %v1318_v36, %v1318_v36 }
0x1219   :  { %1933 = vmatmul.mubr.msk.bf16.vlgmr.msra.gmra.mxu1 %vm159_vm2, %v1319_v25 }
0x121a   :  { %1946 = vmatprep.mubr.msk.bf16.mxu1 %vm2065_vm1, %v2064_v15 }
0x12d9   :  { %v1362_v14 = vpop.f32.mrf.mxu1 }
0x12da   :  { %v1368_v41 = vpack.c.bf16 %v1362_v14, %v1362_v14 }
0x12db   :  { %v1934_v34 = vpop.f32.mrf.mxu1 }
0x12dc   :  { %1939 = vmatmul.mubr.msk.bf16.vlgmr.msra.gmra.mxu0 %vm159_vm2, %v1368_v41 }
0x12dd   :  { %v1365_v37 = vpop.f32.mrf.mxu1  ;;  %1966 = vmatprep.mubr.msk.bf16.mxu0 %vm2065_vm1, %v2064_v15  ;;  %1951 = vmatpush3.bf16.msra.mxu0 %v1990_v59 }
0x12de   :  { %1952 = vmatprep.subr.bf16.mxu0 %v2064_v15 }
0x12df   :  { %v1935_v38 = vpop.f32.mrf.mxu1 }
0x12e1   :  { %1953 = vmatpush3.bf16.msra.mxu0 %v1991_v18 }
0x12e2   :  { %1954 = vmatprep.subr.bf16.mxu0 %v2064_v15 }
0x12e5   :  { %1955 = vmatpush3.bf16.msra.mxu0 %v1992_v20 }
0x12e6   :  { %1956 = vmatprep.subr.bf16.mxu0 %v2064_v15 }
0x12e9   :  { %1957 = vmatpush3.bf16.msra.mxu0 %v1993_v21 }
0x12ea   :  { %1958 = vmatprep.subr.bf16.mxu0 %v2064_v15 }
0x12ed   :  { %1959 = vmatpush3.bf16.msra.mxu0 %v1994_v22 }
0x12ee   :  { %1960 = vmatprep.subr.bf16.mxu0 %v2064_v15 }
0x12f1   :  { %1961 = vmatpush3.bf16.msra.mxu0 %v1995_v0 }
0x12f2   :  { %1962 = vmatprep.subr.bf16.mxu0 %v2064_v15 }
0x12f5   :  { %1963 = vmatpush3.bf16.msra.mxu0 %v1996_v7 }
0x12f6   :  { %1964 = vmatprep.subr.bf16.mxu0 %v2064_v15 }
0x12f9   :  { %1965 = vmatpush3.bf16.msra.mxu0 %v1997_v23 }
0x139c   :  { %v1406_v44 = vpop.f32.mrf.mxu0 }
0x139d   :  { %v1412_v45 = vadd.f32 %v1406_v44, %v1257_v27 }
0x139e   :  { %v1940_v19 = vpop.f32.mrf.mxu0 }
0x139f   :  { %v1414_v47 = vadd.f32 %v1412_v45, %v2153_v1  ;;  %v1988_v1 = vld [vmem:[%s2500_s8 + $0x8] sm:$0xff]  }
0x13a0   :  { %v1409_v48 = vpop.f32.mrf.mxu0  ;;  %1943 = vmatpush3.bf16.msra.mxu1 %v1988_v1 }
0x13a1   :  { %v2427_v49 = vadd.f32 %v1711_v42, %v1414_v47  ;;  %1944 = vmatprep.subr.bf16.mxu1 %v2064_v15  ;;  %v1713_v42 = vld [vmem:[%s2499_s7] ss:$0 sm:$0xff] }
0x13a2   :  { %v1941_v50 = vpop.f32.mrf.mxu0 }
0x13a3   :  { %v1429_v3 = vsel %vm47_vm0, %v2427_v49, 0.0 }
0x13a4   :  { %1430 = vadd.xlane.f32.xlu1 %v1429_v3  ;;  %1945 = vmatpush3.bf16.msra.mxu1 %v1989_v58 }
0x13a8   :  { %1439 = vadd.xlane.f32.xlu1 %v1438_v52 }
0x142d   :  { %v1431_v53 = vpop.xlane.xlu1 %1430 }
0x142e   :  { %v1433_v54 = vmul.f32 0.03125, %v1431_v53 }
0x1430   :  { %v1435_v55 = vsub.f32 %v2427_v49, %v1433_v54 }
0x1431   :  { %v1440_v60 = vpop.xlane.xlu1 %1439 }
0x1432   :  { %v1437_v56 = vmul.f32 %v1435_v55, %v1435_v55  ;;  %v1444_v39 = vmul.f32 0.03125, %v1440_v60 }
0x1434   :  { %v1441_v57 = vsel %vm47_vm0, %v1437_v56, 0.0  ;;  %v1446_v61 = vadd.f32 1e-05, %v1444_v39 }
0x1435   :  { %1442 = vadd.xlane.f32.xlu1 %v1441_v57 }
0x1436   :  { %2034 = vrsqrt.f32 %v1446_v61 }
0x1443   :  { %v2035_v4 = vpop.eup %2034 }
0x1444   :  { %v1450_v5 = vmul.f32 %v2035_v4, %v1434_v46 }
0x1446   :  { %v1458_v10 = vmul.f32 %v1712_v6, %v1450_v5 }
0x1448   :  { %v1466_v12 = vadd.f32 %v1713_v42, %v1458_v10 }
0x14be   :  { %v1443_v62 = vpop.xlane.xlu1 %1442 }
0x14bf   :  { %v1445_v63 = vmul.f32 0.03125, %v1443_v62 }
0x14c1   :  { %v1447_v2 = vadd.f32 1e-05, %v1445_v63 }
0x14c3   :  { %2036 = vrsqrt.f32 %v1447_v2 }
0x14d0   :  { %v2037_v8 = vpop.eup %2036 }
0x14d1   :  { %v1451_v9 = vmul.f32 %v2037_v8, %v1435_v55 }
0x14d3   :  { %v1459_v11 = vmul.f32 %v1712_v6, %v1451_v9 }
0x14d5   :  { %v1467_v16 = vadd.f32 %v1713_v42, %v1459_v11 }
0x14d7   :  { %v1468_v17 = vpack.c.bf16 %v1467_v16, %v1466_v12 }
0x14d9   :  { %1947 = vmatmul.mubr.msk.bf16.vlgmr.msra.gmra.mxu1 %vm47_vm0, %v1468_v17 }
0x1599   :  { %v1529_v26 = vpop.f32.mrf.mxu1 }
0x159a   :  { %v1530_v27 = vadd.f32 %v1714_v24, %v1529_v26 }
0x159b   :  { %v1948_v28 = vpop.f32.mrf.mxu1 }
0x159c   :  { %v1538_v29 = vmul.f32 0.70710677, %v1530_v27  ;;  %v1536_v25 = vmul.f32 0.5, %v1530_v27 }
0x159d   :  { %v1532_v30 = vpop.f32.mrf.mxu1 }
0x159e   :  { %2038 = verf.f32 %v1538_v29  ;;  %v1533_v31 = vadd.f32 %v1714_v24, %v1532_v30 }
0x159f   :  { %v1949_v32 = vpop.f32.mrf.mxu1 }
0x15a0   :  { %v1539_v33 = vmul.f32 0.70710677, %v1533_v31  ;;  %v1537_v14 = vmul.f32 0.5, %v1533_v31 }
0x15a2   :  { %2040 = verf.f32 %v1539_v33 }
0x15ab   :  { %v2039_v15 = vpop.eup %2038 }
0x15ac   :  { %v1542_v35 = vadd.f32 1.0, %v2039_v15 }
0x15ae   :  { %v1544_v34 = vmul.f32 %v1542_v35, %v1536_v25 }
0x15af   :  { %v2041_v36 = vpop.eup %2040 }
0x15b0   :  { %v1543_v41 = vadd.f32 1.0, %v2041_v36 }
0x15b2   :  { %v1545_v37 = vmul.f32 %v1543_v41, %v1537_v14 }
0x15b4   :  { %v1546_v38 = vpack.c.bf16 %v1545_v37, %v1544_v34 }
0x15b6   :  { %1967 = vmatmul.mubr.bf16.vlgmr.msra.gmra.mxu0 %v1546_v38 }
0x1676   :  { %v1652_v43 = vpop.f32.mrf.mxu0 }
0x1677   :  { %v1653_v44 = vadd.f32 %v1718_v40, %v1652_v43 }
0x1678   :  { %v1968_v45 = vpop.f32.mrf.mxu0 }
0x1679   :  { %v1659_v19 = vadd.f32 %v1653_v44, %v2408_v13 }
0x167a   :  { %v1655_v46 = vpop.f32.mrf.mxu0 }
0x167b   :  { %1661 = vst.msk [vmem:[#allocation2] sm:$0xff] %vm47_vm0, %v1659_v19  ;;  %v1656_v47 = vadd.f32 %v1718_v40, %v1655_v46 }
0x167c   :  { %v1969_v48 = vpop.f32.mrf.mxu0 }
0x167d   :  { %v1660_v50 = vadd.f32 %v1656_v47, %v2427_v49 }
0x167f   :  { %1662 = vst.msk [vmem:[#allocation2 + $0x8] sm:$0xff] %vm47_vm0, %v1660_v50 }
0x1680   :  { %2053 = shalt.err (!%p2050_p4)
}
0x1681   :  { %s2078_s11 = smov 128   ;;  %s2079_s30 = smov 8  }
0x1682   :  { %1674 = dma.vmem_to_hbm [thread:$0]  %s1669_s5, 256, %s2504_s12, [#allocation3], %s2078_s11, %s2078_s11, %s2079_s30  }
0x1683   :  { %2062 = dma.done.wait [#allocation3], 256  }
0x1684   :  { %2063 = vsyncadd [#allocation3], 4294967040 }
0x1685   :  { %1678 = vsyncpa [#allocation3], 1 }

</bundles_post_ra>
